<compile_context>
chip_gen: v5e
topology: v5e:2x2
jax: 0.10.0
libtpu: 0.0.40
codegen_flags: <defaults>
</compile_context>

<pallas_src>
import functools
import math

import numpy as np
import jax
import jax.numpy as jnp
from jax.experimental import pallas as pl
from jax.experimental.pallas import tpu as pltpu

# ---------------- small BERT config ----------------
VOCAB = 100
HIDDEN = 32
LAYERS = 2
HEADS = 2
HEAD_DIM = HIDDEN // HEADS
INTER = 64
MAX_POS = 16
TYPE_VOCAB = 2
NUM_LABELS = 2
LN_EPS = 1e-12

# whole-array-in-VMEM spec (no grid; everything is tiny)
_VMEM = pl.BlockSpec(memory_space=pltpu.MemorySpace.VMEM)


# ---------------- in-kernel helpers ----------------
def _ln(x, g, b):
    mean = jnp.mean(x, axis=-1, keepdims=True)
    var = jnp.mean((x - mean) ** 2, axis=-1, keepdims=True)
    return (x - mean) * jax.lax.rsqrt(var + LN_EPS) * g + b


def _gelu(x):
    # exact (erf) GELU, as in BERT's hidden_act="gelu"
    return 0.5 * x * (1.0 + jax.lax.erf(x * (1.0 / math.sqrt(2.0))))


def _softmax_rows(s):
    s = s - jnp.max(s, axis=-1, keepdims=True)
    p = jnp.exp(s)
    # divide on EUP (otherwise-idle slot); negligible accuracy impact
    return p * pl.reciprocal(jnp.sum(p, axis=-1, keepdims=True), approx=True)


# ---------------- the single fused kernel ----------------
def _fused_forward_kernel(
        ids_ref, mask_ref, labels_ref, pos_oh_ref, cross_bias_ref,
        word_emb_ref, pos_emb_ref, type_emb_ref, emb_g_ref, emb_b_ref,
        qkv_w_ref, qkv_b_ref, ao_w_ref, ao_b_ref, ln1_g_ref, ln1_b_ref,
        i_w_ref, i_b_ref, o_w_ref, o_b_ref, ln2_g_ref, ln2_b_ref,
        pool_w_ref, pool_b_ref, cls_w_ref, cls_b_ref,
        logits_ref, loss_ref, *, batch, seq):
    M = batch * seq

    # ---- embeddings: gathers as one-hot MXU matmuls, all in (M, H) layout ----
    vocab_cols = jax.lax.broadcasted_iota(jnp.int32, (M, VOCAB), 1)
    word_oh = (vocab_cols == ids_ref[...]).astype(jnp.float32)          # (M, VOCAB)
    we = jnp.dot(word_oh, word_emb_ref[...], preferred_element_type=jnp.float32)
    pe = jnp.dot(pos_oh_ref[...], pos_emb_ref[...],
                 preferred_element_type=jnp.float32)                    # (M, H)
    te = type_emb_ref[...][0:1, :]                                      # token_type_ids == 0
    h = _ln(we + pe + te, emb_g_ref[...], emb_b_ref[...])               # (M, H)

    # ---- attention bias: padding (-1e4) + block-diagonal batch mask (-1e9) ----
    # hoisted once, reused for every layer and head
    bias = (1.0 - mask_ref[...]) * -10000.0 + cross_bias_ref[...]       # (M, M)

    # ---- encoder layers (weights stacked on leading LAYERS axis, static unroll) ----
    for l in range(LAYERS):
        qkv = jnp.dot(h, qkv_w_ref[l],
                      preferred_element_type=jnp.float32) + qkv_b_ref[l]  # (M, 3H)
        ao_w = ao_w_ref[l]
        attn = jnp.zeros((M, HIDDEN), jnp.float32)
        for hd in range(HEADS):                                          # static unroll
            lo = hd * HEAD_DIM
            qh = qkv[:, lo:lo + HEAD_DIM]          # 1/sqrt(D) already folded into weights
            kh = qkv[:, HIDDEN + lo:HIDDEN + lo + HEAD_DIM]
            vh = qkv[:, 2 * HIDDEN + lo:2 * HIDDEN + lo + HEAD_DIM]
            # flat 2-D scores: q @ k^T over all M rows, cross-batch masked by bias
            s = jax.lax.dot_general(qh, kh, (((1,), (1,)), ((), ())),
                                    preferred_element_type=jnp.float32)  # (M, M)
            p = _softmax_rows(s + bias)
            ctx = jnp.dot(p, vh, preferred_element_type=jnp.float32)     # (M, D)
            # sum_h ctx_h @ W_o[h*D:(h+1)*D, :]  == concat(ctx) @ W_o (no concat needed)
            attn = attn + jnp.dot(ctx, ao_w[lo:lo + HEAD_DIM, :],
                                  preferred_element_type=jnp.float32)
        attn = attn + ao_b_ref[l]

        h = _ln(attn + h, ln1_g_ref[l], ln1_b_ref[l])                    # residual + LN1

        inter = _gelu(jnp.dot(h, i_w_ref[l],
                              preferred_element_type=jnp.float32) + i_b_ref[l])
        ffn = jnp.dot(inter, o_w_ref[l],
                      preferred_element_type=jnp.float32) + o_b_ref[l]
        h = _ln(ffn + h, ln2_g_ref[l], ln2_b_ref[l])                     # residual + LN2

    # ---- CLS rows (0, S, 2S, ...) via one-hot selection matmul ----
    sel_rows = jax.lax.broadcasted_iota(jnp.int32, (batch, M), 0)
    sel_cols = jax.lax.broadcasted_iota(jnp.int32, (batch, M), 1)
    sel = (sel_cols == sel_rows * seq).astype(jnp.float32)               # (B, M)
    cls = jnp.dot(sel, h, preferred_element_type=jnp.float32)            # (B, H)

    # ---- pooler + classifier + mean cross-entropy ----
    pooled = jnp.tanh(jnp.dot(cls, pool_w_ref[...],
                              preferred_element_type=jnp.float32) + pool_b_ref[...])
    logits = jnp.dot(pooled, cls_w_ref[...],
                     preferred_element_type=jnp.float32) + cls_b_ref[...]  # (B, C)
    logits_ref[...] = logits

    m = jnp.max(logits, axis=-1, keepdims=True)
    lse = jnp.log(jnp.sum(jnp.exp(logits - m), axis=-1, keepdims=True)) + m
    logp = logits - lse
    lbl_cols = jax.lax.broadcasted_iota(jnp.int32, logits.shape, 1)
    onehot = (lbl_cols == labels_ref[...]).astype(jnp.float32)            # (B, C)
    nll = -jnp.sum(onehot * logp, axis=-1, keepdims=True)                 # (B, 1)
    loss_ref[...] = jnp.sum(nll, keepdims=True) * (1.0 / batch)


# ---------------- parameter init (deterministic, synthetic) ----------------
def init_params(key):
    keys = iter(jax.random.split(key, 64))

    def norm(shape):
        return 0.02 * jax.random.normal(next(keys), shape, dtype=jnp.float32)

    def zeros(shape):
        return jnp.zeros(shape, jnp.float32)

    def ones(shape):
        return jnp.ones(shape, jnp.float32)

    scale = 1.0 / math.sqrt(HEAD_DIM)       # folded into Q projection (weights & bias)

    qkv_w, qkv_b, ao_w, ao_b = [], [], [], []
    ln1_g, ln1_b, i_w, i_b = [], [], [], []
    o_w, o_b, ln2_g, ln2_b = [], [], [], []
    for _ in range(LAYERS):
        q_w = norm((HIDDEN, HIDDEN)) * scale
        k_w = norm((HIDDEN, HIDDEN))
        v_w = norm((HIDDEN, HIDDEN))
        qkv_w.append(jnp.concatenate([q_w, k_w, v_w], axis=1))   # (H, 3H) fused QKV
        qkv_b.append(zeros((1, 3 * HIDDEN)))                     # (Q bias scaled too: zero)
        ao_w.append(norm((HIDDEN, HIDDEN)))
        ao_b.append(zeros((1, HIDDEN)))
        ln1_g.append(ones((1, HIDDEN)))
        ln1_b.append(zeros((1, HIDDEN)))
        i_w.append(norm((HIDDEN, INTER)))
        i_b.append(zeros((1, INTER)))
        o_w.append(norm((INTER, HIDDEN)))
        o_b.append(zeros((1, HIDDEN)))
        ln2_g.append(ones((1, HIDDEN)))
        ln2_b.append(zeros((1, HIDDEN)))

    return {
        "word_emb": norm((VOCAB, HIDDEN)),
        "pos_emb": norm((MAX_POS, HIDDEN)),
        "type_emb": norm((TYPE_VOCAB, HIDDEN)),
        "emb_ln_g": ones((1, HIDDEN)), "emb_ln_b": zeros((1, HIDDEN)),
        # per-layer weights stacked along a leading LAYERS axis
        "qkv_w": jnp.stack(qkv_w), "qkv_b": jnp.stack(qkv_b),
        "ao_w": jnp.stack(ao_w), "ao_b": jnp.stack(ao_b),
        "ln1_g": jnp.stack(ln1_g), "ln1_b": jnp.stack(ln1_b),
        "i_w": jnp.stack(i_w), "i_b": jnp.stack(i_b),
        "o_w": jnp.stack(o_w), "o_b": jnp.stack(o_b),
        "ln2_g": jnp.stack(ln2_g), "ln2_b": jnp.stack(ln2_b),
        "pool_w": norm((HIDDEN, HIDDEN)), "pool_b": zeros((1, HIDDEN)),
        "cls_w": norm((HIDDEN, NUM_LABELS)), "cls_b": zeros((1, NUM_LABELS)),
    }


# ---------------- forward: ONE fused pallas_call ----------------
def decoder_forward(params, input_ids, attention_mask, labels):
    B, S = input_ids.shape
    assert S <= MAX_POS  # BERT position-embedding limit
    M = B * S

    # tiny trace-time constants (baked into the executable, zero runtime XLA ops)
    pos_idx = np.arange(M) % S
    pos_oh = jnp.asarray(np.eye(MAX_POS, dtype=np.float32)[pos_idx])          # (M, MAX_POS)
    batch_idx = np.arange(M) // S
    same_batch = (batch_idx[:, None] == batch_idx[None, :]).astype(np.float32)
    cross_bias = jnp.asarray((same_batch - 1.0) * 1e9)                        # (M, M)

    ids2d = input_ids.reshape(M, 1).astype(jnp.int32)
    mask1m = attention_mask.reshape(1, M).astype(jnp.float32)
    labels2d = labels.reshape(B, 1).astype(jnp.int32)

    logits, loss = pl.pallas_call(
        functools.partial(_fused_forward_kernel, batch=B, seq=S),
        out_shape=(jax.ShapeDtypeStruct((B, NUM_LABELS), jnp.float32),
                   jax.ShapeDtypeStruct((1, 1), jnp.float32)),
        in_specs=[_VMEM] * 26,
        out_specs=(_VMEM, _VMEM),
    )(ids2d, mask1m, labels2d, pos_oh, cross_bias,
      params["word_emb"], params["pos_emb"], params["type_emb"],
      params["emb_ln_g"], params["emb_ln_b"],
      params["qkv_w"], params["qkv_b"], params["ao_w"], params["ao_b"],
      params["ln1_g"], params["ln1_b"], params["i_w"], params["i_b"],
      params["o_w"], params["o_b"], params["ln2_g"], params["ln2_b"],
      params["pool_w"], params["pool_b"], params["cls_w"], params["cls_b"])

    # matches HF SequenceClassifierOutput(loss=..., logits=...)
    return loss[0, 0], logits


# TODO(synk): pretrained-checkpoint loading (from_pretrained) is replaced by
#             deterministic random init; dropout omitted (eval semantics);
#             CrossEntropyLoss ignore_index=-100 is not handled.

if __name__ == "__main__":
    key = jax.random.PRNGKey(0)
    pkey, ikey = jax.random.split(key)
    params = init_params(pkey)

    B, S = 2, 8
    input_ids = jax.random.randint(ikey, (B, S), 0, VOCAB, dtype=jnp.int32)
    attention_mask = jnp.array(
        [[1, 1, 1, 1, 1, 1, 1, 1],
         [1, 1, 1, 1, 1, 1, 0, 0]], dtype=jnp.int32)
    labels = jnp.array([0, 1], dtype=jnp.int32)

    fwd = jax.jit(decoder_forward)
    loss, logits = fwd(params, input_ids, attention_mask, labels)
    jax.block_until_ready((loss, logits))
    assert logits.shape == (B, NUM_LABELS)
    assert loss.shape == ()
    print("KERNEL_OK")
</pallas_src>

<mosaic_0001>
module attributes {stable_mosaic.version = 11 : i64} {
  func.func @_fused_forward_kernel(%arg0: memref<16x1xi32, #tpu.memory_space<vmem>>, %arg1: memref<1x16xf32, #tpu.memory_space<vmem>>, %arg2: memref<2x1xi32, #tpu.memory_space<vmem>>, %arg3: memref<16x16xf32, #tpu.memory_space<vmem>>, %arg4: memref<16x16xf32, #tpu.memory_space<vmem>>, %arg5: memref<100x32xf32, #tpu.memory_space<vmem>>, %arg6: memref<16x32xf32, #tpu.memory_space<vmem>>, %arg7: memref<2x32xf32, #tpu.memory_space<vmem>>, %arg8: memref<1x32xf32, #tpu.memory_space<vmem>>, %arg9: memref<1x32xf32, #tpu.memory_space<vmem>>, %arg10: memref<2x32x96xf32, #tpu.memory_space<vmem>>, %arg11: memref<2x1x96xf32, #tpu.memory_space<vmem>>, %arg12: memref<2x32x32xf32, #tpu.memory_space<vmem>>, %arg13: memref<2x1x32xf32, #tpu.memory_space<vmem>>, %arg14: memref<2x1x32xf32, #tpu.memory_space<vmem>>, %arg15: memref<2x1x32xf32, #tpu.memory_space<vmem>>, %arg16: memref<2x32x64xf32, #tpu.memory_space<vmem>>, %arg17: memref<2x1x64xf32, #tpu.memory_space<vmem>>, %arg18: memref<2x64x32xf32, #tpu.memory_space<vmem>>, %arg19: memref<2x1x32xf32, #tpu.memory_space<vmem>>, %arg20: memref<2x1x32xf32, #tpu.memory_space<vmem>>, %arg21: memref<2x1x32xf32, #tpu.memory_space<vmem>>, %arg22: memref<32x32xf32, #tpu.memory_space<vmem>>, %arg23: memref<1x32xf32, #tpu.memory_space<vmem>>, %arg24: memref<32x2xf32, #tpu.memory_space<vmem>>, %arg25: memref<1x2xf32, #tpu.memory_space<vmem>>, %arg26: memref<2x2xf32, #tpu.memory_space<vmem>>, %arg27: memref<1x1xf32, #tpu.memory_space<vmem>>) attributes {dimension_semantics = [], scalar_prefetch = 0 : i64, scratch_operands = 0 : i64, tpu.core_type = #tpu.core_type<tc>} {
    %0 = tpu.iota {dimensions = array<i32: 1>} : vector<16x100xi32>
    %c0 = arith.constant 0 : index
    %c0_0 = arith.constant 0 : index
    %1 = vector.load %arg0[%c0, %c0_0] : memref<16x1xi32, #tpu.memory_space<vmem>>, vector<16x1xi32>
    %2 = vector.broadcast %1 : vector<16x1xi32> to vector<16x100xi32>
    %3 = arith.cmpi eq, %0, %2 : vector<16x100xi32>
    %4 = arith.extui %3 : vector<16x100xi1> to vector<16x100xi32>
    %5 = arith.sitofp %4 : vector<16x100xi32> to vector<16x100xf32>
    %c0_1 = arith.constant 0 : index
    %c0_2 = arith.constant 0 : index
    %6 = vector.load %arg5[%c0_1, %c0_2] : memref<100x32xf32, #tpu.memory_space<vmem>>, vector<100x32xf32>
    %cst = arith.constant dense<0.000000e+00> : vector<16x32xf32>
    %7 = tpu.matmul %5, %6, %cst {dimension_numbers = #tpu.dot_dimension_numbers<[1], [0], [0], [1], [0, 0, 1, 1], [], []>} : vector<16x100xf32>, vector<100x32xf32>, vector<16x32xf32> -> vector<16x32xf32>
    %c0_3 = arith.constant 0 : index
    %c0_4 = arith.constant 0 : index
    %8 = vector.load %arg3[%c0_3, %c0_4] : memref<16x16xf32, #tpu.memory_space<vmem>>, vector<16x16xf32>
    %c0_5 = arith.constant 0 : index
    %c0_6 = arith.constant 0 : index
    %9 = vector.load %arg6[%c0_5, %c0_6] : memref<16x32xf32, #tpu.memory_space<vmem>>, vector<16x32xf32>
    %cst_7 = arith.constant dense<0.000000e+00> : vector<16x32xf32>
    %10 = tpu.matmul %8, %9, %cst_7 {dimension_numbers = #tpu.dot_dimension_numbers<[1], [0], [0], [1], [0, 0, 1, 1], [], []>} : vector<16x16xf32>, vector<16x32xf32>, vector<16x32xf32> -> vector<16x32xf32>
    %c0_8 = arith.constant 0 : index
    %c0_9 = arith.constant 0 : index
    %11 = vector.load %arg7[%c0_8, %c0_9] : memref<2x32xf32, #tpu.memory_space<vmem>>, vector<2x32xf32>
    %12 = vector.extract_strided_slice %11 {offsets = [0, 0], sizes = [1, 32], strides = [1, 1]} : vector<2x32xf32> to vector<1x32xf32>
    %13 = arith.addf %7, %10 : vector<16x32xf32>
    %14 = vector.broadcast %12 : vector<1x32xf32> to vector<16x32xf32>
    %15 = arith.addf %13, %14 : vector<16x32xf32>
    %c0_10 = arith.constant 0 : index
    %c0_11 = arith.constant 0 : index
    %16 = vector.load %arg8[%c0_10, %c0_11] : memref<1x32xf32, #tpu.memory_space<vmem>>, vector<1x32xf32>
    %c0_12 = arith.constant 0 : index
    %c0_13 = arith.constant 0 : index
    %17 = vector.load %arg9[%c0_12, %c0_13] : memref<1x32xf32, #tpu.memory_space<vmem>>, vector<1x32xf32>
    %cst_14 = arith.constant dense<0.000000e+00> : vector<16xf32>
    %18 = vector.multi_reduction <add>, %15, %cst_14 [1] : vector<16x32xf32> to vector<16xf32>
    %19 = vector.shape_cast %18 : vector<16xf32> to vector<16x1xf32>
    %cst_15 = arith.constant 3.200000e+01 : f32
    %20 = vector.broadcast %cst_15 : f32 to vector<16x1xf32>
    %21 = arith.divf %19, %20 : vector<16x1xf32>
    %22 = vector.broadcast %21 : vector<16x1xf32> to vector<16x32xf32>
    %23 = arith.subf %15, %22 : vector<16x32xf32>
    %24 = arith.mulf %23, %23 : vector<16x32xf32>
    %cst_16 = arith.constant dense<0.000000e+00> : vector<16xf32>
    %25 = vector.multi_reduction <add>, %24, %cst_16 [1] : vector<16x32xf32> to vector<16xf32>
    %26 = vector.shape_cast %25 : vector<16xf32> to vector<16x1xf32>
    %cst_17 = arith.constant 3.200000e+01 : f32
    %27 = vector.broadcast %cst_17 : f32 to vector<16x1xf32>
    %28 = arith.divf %26, %27 : vector<16x1xf32>
    %29 = vector.broadcast %21 : vector<16x1xf32> to vector<16x32xf32>
    %30 = arith.subf %15, %29 : vector<16x32xf32>
    %cst_18 = arith.constant 9.99999996E-13 : f32
    %31 = vector.broadcast %cst_18 : f32 to vector<16x1xf32>
    %32 = arith.addf %28, %31 : vector<16x1xf32>
    %33 = math.rsqrt %32 : vector<16x1xf32>
    %34 = vector.broadcast %33 : vector<16x1xf32> to vector<16x32xf32>
    %35 = arith.mulf %30, %34 : vector<16x32xf32>
    %36 = vector.broadcast %16 : vector<1x32xf32> to vector<16x32xf32>
    %37 = arith.mulf %35, %36 : vector<16x32xf32>
    %38 = vector.broadcast %17 : vector<1x32xf32> to vector<16x32xf32>
    %39 = arith.addf %37, %38 : vector<16x32xf32>
    %c0_19 = arith.constant 0 : index
    %c0_20 = arith.constant 0 : index
    %40 = vector.load %arg1[%c0_19, %c0_20] : memref<1x16xf32, #tpu.memory_space<vmem>>, vector<1x16xf32>
    %cst_21 = arith.constant 1.000000e+00 : f32
    %41 = vector.broadcast %cst_21 : f32 to vector<1x16xf32>
    %42 = arith.subf %41, %40 : vector<1x16xf32>
    %cst_22 = arith.constant -1.000000e+04 : f32
    %43 = vector.broadcast %cst_22 : f32 to vector<1x16xf32>
    %44 = arith.mulf %42, %43 : vector<1x16xf32>
    %c0_23 = arith.constant 0 : index
    %c0_24 = arith.constant 0 : index
    %45 = vector.load %arg4[%c0_23, %c0_24] : memref<16x16xf32, #tpu.memory_space<vmem>>, vector<16x16xf32>
    %46 = vector.broadcast %44 : vector<1x16xf32> to vector<16x16xf32>
    %47 = arith.addf %46, %45 : vector<16x16xf32>
    %c0_25 = arith.constant 0 : index
    %c0_26 = arith.constant 0 : index
    %c0_27 = arith.constant 0 : index
    %48 = vector.load %arg10[%c0_25, %c0_26, %c0_27] : memref<2x32x96xf32, #tpu.memory_space<vmem>>, vector<1x32x96xf32>
    %49 = vector.shape_cast %48 : vector<1x32x96xf32> to vector<32x96xf32>
    %cst_28 = arith.constant dense<0.000000e+00> : vector<16x96xf32>
    %50 = tpu.matmul %39, %49, %cst_28 {dimension_numbers = #tpu.dot_dimension_numbers<[1], [0], [0], [1], [0, 0, 1, 1], [], []>} : vector<16x32xf32>, vector<32x96xf32>, vector<16x96xf32> -> vector<16x96xf32>
    %c0_29 = arith.constant 0 : index
    %c0_30 = arith.constant 0 : index
    %c0_31 = arith.constant 0 : index
    %51 = vector.load %arg11[%c0_29, %c0_30, %c0_31] : memref<2x1x96xf32, #tpu.memory_space<vmem>>, vector<1x1x96xf32>
    %52 = vector.shape_cast %51 : vector<1x1x96xf32> to vector<1x96xf32>
    %53 = vector.broadcast %52 : vector<1x96xf32> to vector<16x96xf32>
    %54 = arith.addf %50, %53 : vector<16x96xf32>
    %c0_32 = arith.constant 0 : index
    %c0_33 = arith.constant 0 : index
    %c0_34 = arith.constant 0 : index
    %55 = vector.load %arg12[%c0_32, %c0_33, %c0_34] : memref<2x32x32xf32, #tpu.memory_space<vmem>>, vector<1x32x32xf32>
    %56 = vector.shape_cast %55 : vector<1x32x32xf32> to vector<32x32xf32>
    %cst_35 = arith.constant 0.000000e+00 : f32
    %57 = vector.broadcast %cst_35 : f32 to vector<16x32xf32>
    %58 = vector.extract_strided_slice %54 {offsets = [0, 0], sizes = [16, 16], strides = [1, 1]} : vector<16x96xf32> to vector<16x16xf32>
    %59 = vector.extract_strided_slice %54 {offsets = [0, 32], sizes = [16, 16], strides = [1, 1]} : vector<16x96xf32> to vector<16x16xf32>
    %60 = vector.extract_strided_slice %54 {offsets = [0, 64], sizes = [16, 16], strides = [1, 1]} : vector<16x96xf32> to vector<16x16xf32>
    %cst_36 = arith.constant dense<0.000000e+00> : vector<16x16xf32>
    %61 = tpu.matmul %58, %59, %cst_36 {dimension_numbers = #tpu.dot_dimension_numbers<[1], [1], [0], [0], [0, 0, 1, 0], [], []>} : vector<16x16xf32>, vector<16x16xf32>, vector<16x16xf32> -> vector<16x16xf32>
    %62 = arith.addf %61, %47 : vector<16x16xf32>
    %cst_37 = arith.constant dense<0xFF800000> : vector<16xf32>
    %63 = vector.multi_reduction <maximumf>, %62, %cst_37 [1] : vector<16x16xf32> to vector<16xf32>
    %64 = vector.shape_cast %63 : vector<16xf32> to vector<16x1xf32>
    %65 = vector.broadcast %64 : vector<16x1xf32> to vector<16x16xf32>
    %66 = arith.subf %62, %65 : vector<16x16xf32>
    %67 = math.exp %66 : vector<16x16xf32>
    %cst_38 = arith.constant dense<0.000000e+00> : vector<16xf32>
    %68 = vector.multi_reduction <add>, %67, %cst_38 [1] : vector<16x16xf32> to vector<16xf32>
    %69 = vector.shape_cast %68 : vector<16xf32> to vector<16x1xf32>
    %70 = tpu.reciprocal %69 {approx = true} : vector<16x1xf32> -> vector<16x1xf32>
    %71 = vector.broadcast %70 : vector<16x1xf32> to vector<16x16xf32>
    %72 = arith.mulf %67, %71 : vector<16x16xf32>
    %cst_39 = arith.constant dense<0.000000e+00> : vector<16x16xf32>
    %73 = tpu.matmul %72, %60, %cst_39 {dimension_numbers = #tpu.dot_dimension_numbers<[1], [0], [0], [1], [0, 0, 1, 1], [], []>} : vector<16x16xf32>, vector<16x16xf32>, vector<16x16xf32> -> vector<16x16xf32>
    %74 = vector.extract_strided_slice %56 {offsets = [0, 0], sizes = [16, 32], strides = [1, 1]} : vector<32x32xf32> to vector<16x32xf32>
    %cst_40 = arith.constant dense<0.000000e+00> : vector<16x32xf32>
    %75 = tpu.matmul %73, %74, %cst_40 {dimension_numbers = #tpu.dot_dimension_numbers<[1], [0], [0], [1], [0, 0, 1, 1], [], []>} : vector<16x16xf32>, vector<16x32xf32>, vector<16x32xf32> -> vector<16x32xf32>
    %76 = arith.addf %57, %75 : vector<16x32xf32>
    %77 = vector.extract_strided_slice %54 {offsets = [0, 16], sizes = [16, 16], strides = [1, 1]} : vector<16x96xf32> to vector<16x16xf32>
    %78 = vector.extract_strided_slice %54 {offsets = [0, 48], sizes = [16, 16], strides = [1, 1]} : vector<16x96xf32> to vector<16x16xf32>
    %79 = vector.extract_strided_slice %54 {offsets = [0, 80], sizes = [16, 16], strides = [1, 1]} : vector<16x96xf32> to vector<16x16xf32>
    %cst_41 = arith.constant dense<0.000000e+00> : vector<16x16xf32>
    %80 = tpu.matmul %77, %78, %cst_41 {dimension_numbers = #tpu.dot_dimension_numbers<[1], [1], [0], [0], [0, 0, 1, 0], [], []>} : vector<16x16xf32>, vector<16x16xf32>, vector<16x16xf32> -> vector<16x16xf32>
    %81 = arith.addf %80, %47 : vector<16x16xf32>
    %cst_42 = arith.constant dense<0xFF800000> : vector<16xf32>
    %82 = vector.multi_reduction <maximumf>, %81, %cst_42 [1] : vector<16x16xf32> to vector<16xf32>
    %83 = vector.shape_cast %82 : vector<16xf32> to vector<16x1xf32>
    %84 = vector.broadcast %83 : vector<16x1xf32> to vector<16x16xf32>
    %85 = arith.subf %81, %84 : vector<16x16xf32>
    %86 = math.exp %85 : vector<16x16xf32>
    %cst_43 = arith.constant dense<0.000000e+00> : vector<16xf32>
    %87 = vector.multi_reduction <add>, %86, %cst_43 [1] : vector<16x16xf32> to vector<16xf32>
    %88 = vector.shape_cast %87 : vector<16xf32> to vector<16x1xf32>
    %89 = tpu.reciprocal %88 {approx = true} : vector<16x1xf32> -> vector<16x1xf32>
    %90 = vector.broadcast %89 : vector<16x1xf32> to vector<16x16xf32>
    %91 = arith.mulf %86, %90 : vector<16x16xf32>
    %cst_44 = arith.constant dense<0.000000e+00> : vector<16x16xf32>
    %92 = tpu.matmul %91, %79, %cst_44 {dimension_numbers = #tpu.dot_dimension_numbers<[1], [0], [0], [1], [0, 0, 1, 1], [], []>} : vector<16x16xf32>, vector<16x16xf32>, vector<16x16xf32> -> vector<16x16xf32>
    %93 = vector.extract_strided_slice %56 {offsets = [16, 0], sizes = [16, 32], strides = [1, 1]} : vector<32x32xf32> to vector<16x32xf32>
    %cst_45 = arith.constant dense<0.000000e+00> : vector<16x32xf32>
    %94 = tpu.matmul %92, %93, %cst_45 {dimension_numbers = #tpu.dot_dimension_numbers<[1], [0], [0], [1], [0, 0, 1, 1], [], []>} : vector<16x16xf32>, vector<16x32xf32>, vector<16x32xf32> -> vector<16x32xf32>
    %95 = arith.addf %76, %94 : vector<16x32xf32>
    %c0_46 = arith.constant 0 : index
    %c0_47 = arith.constant 0 : index
    %c0_48 = arith.constant 0 : index
    %96 = vector.load %arg13[%c0_46, %c0_47, %c0_48] : memref<2x1x32xf32, #tpu.memory_space<vmem>>, vector<1x1x32xf32>
    %97 = vector.shape_cast %96 : vector<1x1x32xf32> to vector<1x32xf32>
    %98 = vector.broadcast %97 : vector<1x32xf32> to vector<16x32xf32>
    %99 = arith.addf %95, %98 : vector<16x32xf32>
    %100 = arith.addf %99, %39 : vector<16x32xf32>
    %c0_49 = arith.constant 0 : index
    %c0_50 = arith.constant 0 : index
    %c0_51 = arith.constant 0 : index
    %101 = vector.load %arg14[%c0_49, %c0_50, %c0_51] : memref<2x1x32xf32, #tpu.memory_space<vmem>>, vector<1x1x32xf32>
    %102 = vector.shape_cast %101 : vector<1x1x32xf32> to vector<1x32xf32>
    %c0_52 = arith.constant 0 : index
    %c0_53 = arith.constant 0 : index
    %c0_54 = arith.constant 0 : index
    %103 = vector.load %arg15[%c0_52, %c0_53, %c0_54] : memref<2x1x32xf32, #tpu.memory_space<vmem>>, vector<1x1x32xf32>
    %104 = vector.shape_cast %103 : vector<1x1x32xf32> to vector<1x32xf32>
    %cst_55 = arith.constant dense<0.000000e+00> : vector<16xf32>
    %105 = vector.multi_reduction <add>, %100, %cst_55 [1] : vector<16x32xf32> to vector<16xf32>
    %106 = vector.shape_cast %105 : vector<16xf32> to vector<16x1xf32>
    %cst_56 = arith.constant 3.200000e+01 : f32
    %107 = vector.broadcast %cst_56 : f32 to vector<16x1xf32>
    %108 = arith.divf %106, %107 : vector<16x1xf32>
    %109 = vector.broadcast %108 : vector<16x1xf32> to vector<16x32xf32>
    %110 = arith.subf %100, %109 : vector<16x32xf32>
    %111 = arith.mulf %110, %110 : vector<16x32xf32>
    %cst_57 = arith.constant dense<0.000000e+00> : vector<16xf32>
    %112 = vector.multi_reduction <add>, %111, %cst_57 [1] : vector<16x32xf32> to vector<16xf32>
    %113 = vector.shape_cast %112 : vector<16xf32> to vector<16x1xf32>
    %cst_58 = arith.constant 3.200000e+01 : f32
    %114 = vector.broadcast %cst_58 : f32 to vector<16x1xf32>
    %115 = arith.divf %113, %114 : vector<16x1xf32>
    %116 = vector.broadcast %108 : vector<16x1xf32> to vector<16x32xf32>
    %117 = arith.subf %100, %116 : vector<16x32xf32>
    %cst_59 = arith.constant 9.99999996E-13 : f32
    %118 = vector.broadcast %cst_59 : f32 to vector<16x1xf32>
    %119 = arith.addf %115, %118 : vector<16x1xf32>
    %120 = math.rsqrt %119 : vector<16x1xf32>
    %121 = vector.broadcast %120 : vector<16x1xf32> to vector<16x32xf32>
    %122 = arith.mulf %117, %121 : vector<16x32xf32>
    %123 = vector.broadcast %102 : vector<1x32xf32> to vector<16x32xf32>
    %124 = arith.mulf %122, %123 : vector<16x32xf32>
    %125 = vector.broadcast %104 : vector<1x32xf32> to vector<16x32xf32>
    %126 = arith.addf %124, %125 : vector<16x32xf32>
    %c0_60 = arith.constant 0 : index
    %c0_61 = arith.constant 0 : index
    %c0_62 = arith.constant 0 : index
    %127 = vector.load %arg16[%c0_60, %c0_61, %c0_62] : memref<2x32x64xf32, #tpu.memory_space<vmem>>, vector<1x32x64xf32>
    %128 = vector.shape_cast %127 : vector<1x32x64xf32> to vector<32x64xf32>
    %cst_63 = arith.constant dense<0.000000e+00> : vector<16x64xf32>
    %129 = tpu.matmul %126, %128, %cst_63 {dimension_numbers = #tpu.dot_dimension_numbers<[1], [0], [0], [1], [0, 0, 1, 1], [], []>} : vector<16x32xf32>, vector<32x64xf32>, vector<16x64xf32> -> vector<16x64xf32>
    %c0_64 = arith.constant 0 : index
    %c0_65 = arith.constant 0 : index
    %c0_66 = arith.constant 0 : index
    %130 = vector.load %arg17[%c0_64, %c0_65, %c0_66] : memref<2x1x64xf32, #tpu.memory_space<vmem>>, vector<1x1x64xf32>
    %131 = vector.shape_cast %130 : vector<1x1x64xf32> to vector<1x64xf32>
    %132 = vector.broadcast %131 : vector<1x64xf32> to vector<16x64xf32>
    %133 = arith.addf %129, %132 : vector<16x64xf32>
    %cst_67 = arith.constant 5.000000e-01 : f32
    %134 = vector.broadcast %cst_67 : f32 to vector<16x64xf32>
    %135 = arith.mulf %134, %133 : vector<16x64xf32>
    %cst_68 = arith.constant 0.707106769 : f32
    %136 = vector.broadcast %cst_68 : f32 to vector<16x64xf32>
    %137 = arith.mulf %133, %136 : vector<16x64xf32>
    %138 = math.erf %137 : vector<16x64xf32>
    %cst_69 = arith.constant 1.000000e+00 : f32
    %139 = vector.broadcast %cst_69 : f32 to vector<16x64xf32>
    %140 = arith.addf %139, %138 : vector<16x64xf32>
    %141 = arith.mulf %135, %140 : vector<16x64xf32>
    %c0_70 = arith.constant 0 : index
    %c0_71 = arith.constant 0 : index
    %c0_72 = arith.constant 0 : index
    %142 = vector.load %arg18[%c0_70, %c0_71, %c0_72] : memref<2x64x32xf32, #tpu.memory_space<vmem>>, vector<1x64x32xf32>
    %143 = vector.shape_cast %142 : vector<1x64x32xf32> to vector<64x32xf32>
    %cst_73 = arith.constant dense<0.000000e+00> : vector<16x32xf32>
    %144 = tpu.matmul %141, %143, %cst_73 {dimension_numbers = #tpu.dot_dimension_numbers<[1], [0], [0], [1], [0, 0, 1, 1], [], []>} : vector<16x64xf32>, vector<64x32xf32>, vector<16x32xf32> -> vector<16x32xf32>
    %c0_74 = arith.constant 0 : index
    %c0_75 = arith.constant 0 : index
    %c0_76 = arith.constant 0 : index
    %145 = vector.load %arg19[%c0_74, %c0_75, %c0_76] : memref<2x1x32xf32, #tpu.memory_space<vmem>>, vector<1x1x32xf32>
    %146 = vector.shape_cast %145 : vector<1x1x32xf32> to vector<1x32xf32>
    %147 = vector.broadcast %146 : vector<1x32xf32> to vector<16x32xf32>
    %148 = arith.addf %144, %147 : vector<16x32xf32>
    %149 = arith.addf %148, %126 : vector<16x32xf32>
    %c0_77 = arith.constant 0 : index
    %c0_78 = arith.constant 0 : index
    %c0_79 = arith.constant 0 : index
    %150 = vector.load %arg20[%c0_77, %c0_78, %c0_79] : memref<2x1x32xf32, #tpu.memory_space<vmem>>, vector<1x1x32xf32>
    %151 = vector.shape_cast %150 : vector<1x1x32xf32> to vector<1x32xf32>
    %c0_80 = arith.constant 0 : index
    %c0_81 = arith.constant 0 : index
    %c0_82 = arith.constant 0 : index
    %152 = vector.load %arg21[%c0_80, %c0_81, %c0_82] : memref<2x1x32xf32, #tpu.memory_space<vmem>>, vector<1x1x32xf32>
    %153 = vector.shape_cast %152 : vector<1x1x32xf32> to vector<1x32xf32>
    %cst_83 = arith.constant dense<0.000000e+00> : vector<16xf32>
    %154 = vector.multi_reduction <add>, %149, %cst_83 [1] : vector<16x32xf32> to vector<16xf32>
    %155 = vector.shape_cast %154 : vector<16xf32> to vector<16x1xf32>
    %cst_84 = arith.constant 3.200000e+01 : f32
    %156 = vector.broadcast %cst_84 : f32 to vector<16x1xf32>
    %157 = arith.divf %155, %156 : vector<16x1xf32>
    %158 = vector.broadcast %157 : vector<16x1xf32> to vector<16x32xf32>
    %159 = arith.subf %149, %158 : vector<16x32xf32>
    %160 = arith.mulf %159, %159 : vector<16x32xf32>
    %cst_85 = arith.constant dense<0.000000e+00> : vector<16xf32>
    %161 = vector.multi_reduction <add>, %160, %cst_85 [1] : vector<16x32xf32> to vector<16xf32>
    %162 = vector.shape_cast %161 : vector<16xf32> to vector<16x1xf32>
    %cst_86 = arith.constant 3.200000e+01 : f32
    %163 = vector.broadcast %cst_86 : f32 to vector<16x1xf32>
    %164 = arith.divf %162, %163 : vector<16x1xf32>
    %165 = vector.broadcast %157 : vector<16x1xf32> to vector<16x32xf32>
    %166 = arith.subf %149, %165 : vector<16x32xf32>
    %cst_87 = arith.constant 9.99999996E-13 : f32
    %167 = vector.broadcast %cst_87 : f32 to vector<16x1xf32>
    %168 = arith.addf %164, %167 : vector<16x1xf32>
    %169 = math.rsqrt %168 : vector<16x1xf32>
    %170 = vector.broadcast %169 : vector<16x1xf32> to vector<16x32xf32>
    %171 = arith.mulf %166, %170 : vector<16x32xf32>
    %172 = vector.broadcast %151 : vector<1x32xf32> to vector<16x32xf32>
    %173 = arith.mulf %171, %172 : vector<16x32xf32>
    %174 = vector.broadcast %153 : vector<1x32xf32> to vector<16x32xf32>
    %175 = arith.addf %173, %174 : vector<16x32xf32>
    %c1 = arith.constant 1 : index
    %c0_88 = arith.constant 0 : index
    %c0_89 = arith.constant 0 : index
    %176 = vector.load %arg10[%c1, %c0_88, %c0_89] : memref<2x32x96xf32, #tpu.memory_space<vmem>>, vector<1x32x96xf32>
    %177 = vector.shape_cast %176 : vector<1x32x96xf32> to vector<32x96xf32>
    %cst_90 = arith.constant dense<0.000000e+00> : vector<16x96xf32>
    %178 = tpu.matmul %175, %177, %cst_90 {dimension_numbers = #tpu.dot_dimension_numbers<[1], [0], [0], [1], [0, 0, 1, 1], [], []>} : vector<16x32xf32>, vector<32x96xf32>, vector<16x96xf32> -> vector<16x96xf32>
    %c1_91 = arith.constant 1 : index
    %c0_92 = arith.constant 0 : index
    %c0_93 = arith.constant 0 : index
    %179 = vector.load %arg11[%c1_91, %c0_92, %c0_93] : memref<2x1x96xf32, #tpu.memory_space<vmem>>, vector<1x1x96xf32>
    %180 = vector.shape_cast %179 : vector<1x1x96xf32> to vector<1x96xf32>
    %181 = vector.broadcast %180 : vector<1x96xf32> to vector<16x96xf32>
    %182 = arith.addf %178, %181 : vector<16x96xf32>
    %c1_94 = arith.constant 1 : index
    %c0_95 = arith.constant 0 : index
    %c0_96 = arith.constant 0 : index
    %183 = vector.load %arg12[%c1_94, %c0_95, %c0_96] : memref<2x32x32xf32, #tpu.memory_space<vmem>>, vector<1x32x32xf32>
    %184 = vector.shape_cast %183 : vector<1x32x32xf32> to vector<32x32xf32>
    %cst_97 = arith.constant 0.000000e+00 : f32
    %185 = vector.broadcast %cst_97 : f32 to vector<16x32xf32>
    %186 = vector.extract_strided_slice %182 {offsets = [0, 0], sizes = [16, 16], strides = [1, 1]} : vector<16x96xf32> to vector<16x16xf32>
    %187 = vector.extract_strided_slice %182 {offsets = [0, 32], sizes = [16, 16], strides = [1, 1]} : vector<16x96xf32> to vector<16x16xf32>
    %188 = vector.extract_strided_slice %182 {offsets = [0, 64], sizes = [16, 16], strides = [1, 1]} : vector<16x96xf32> to vector<16x16xf32>
    %cst_98 = arith.constant dense<0.000000e+00> : vector<16x16xf32>
    %189 = tpu.matmul %186, %187, %cst_98 {dimension_numbers = #tpu.dot_dimension_numbers<[1], [1], [0], [0], [0, 0, 1, 0], [], []>} : vector<16x16xf32>, vector<16x16xf32>, vector<16x16xf32> -> vector<16x16xf32>
    %190 = arith.addf %189, %47 : vector<16x16xf32>
    %cst_99 = arith.constant dense<0xFF800000> : vector<16xf32>
    %191 = vector.multi_reduction <maximumf>, %190, %cst_99 [1] : vector<16x16xf32> to vector<16xf32>
    %192 = vector.shape_cast %191 : vector<16xf32> to vector<16x1xf32>
    %193 = vector.broadcast %192 : vector<16x1xf32> to vector<16x16xf32>
    %194 = arith.subf %190, %193 : vector<16x16xf32>
    %195 = math.exp %194 : vector<16x16xf32>
    %cst_100 = arith.constant dense<0.000000e+00> : vector<16xf32>
    %196 = vector.multi_reduction <add>, %195, %cst_100 [1] : vector<16x16xf32> to vector<16xf32>
    %197 = vector.shape_cast %196 : vector<16xf32> to vector<16x1xf32>
    %198 = tpu.reciprocal %197 {approx = true} : vector<16x1xf32> -> vector<16x1xf32>
    %199 = vector.broadcast %198 : vector<16x1xf32> to vector<16x16xf32>
    %200 = arith.mulf %195, %199 : vector<16x16xf32>
    %cst_101 = arith.constant dense<0.000000e+00> : vector<16x16xf32>
    %201 = tpu.matmul %200, %188, %cst_101 {dimension_numbers = #tpu.dot_dimension_numbers<[1], [0], [0], [1], [0, 0, 1, 1], [], []>} : vector<16x16xf32>, vector<16x16xf32>, vector<16x16xf32> -> vector<16x16xf32>
    %202 = vector.extract_strided_slice %184 {offsets = [0, 0], sizes = [16, 32], strides = [1, 1]} : vector<32x32xf32> to vector<16x32xf32>
    %cst_102 = arith.constant dense<0.000000e+00> : vector<16x32xf32>
    %203 = tpu.matmul %201, %202, %cst_102 {dimension_numbers = #tpu.dot_dimension_numbers<[1], [0], [0], [1], [0, 0, 1, 1], [], []>} : vector<16x16xf32>, vector<16x32xf32>, vector<16x32xf32> -> vector<16x32xf32>
    %204 = arith.addf %185, %203 : vector<16x32xf32>
    %205 = vector.extract_strided_slice %182 {offsets = [0, 16], sizes = [16, 16], strides = [1, 1]} : vector<16x96xf32> to vector<16x16xf32>
    %206 = vector.extract_strided_slice %182 {offsets = [0, 48], sizes = [16, 16], strides = [1, 1]} : vector<16x96xf32> to vector<16x16xf32>
    %207 = vector.extract_strided_slice %182 {offsets = [0, 80], sizes = [16, 16], strides = [1, 1]} : vector<16x96xf32> to vector<16x16xf32>
    %cst_103 = arith.constant dense<0.000000e+00> : vector<16x16xf32>
    %208 = tpu.matmul %205, %206, %cst_103 {dimension_numbers = #tpu.dot_dimension_numbers<[1], [1], [0], [0], [0, 0, 1, 0], [], []>} : vector<16x16xf32>, vector<16x16xf32>, vector<16x16xf32> -> vector<16x16xf32>
    %209 = arith.addf %208, %47 : vector<16x16xf32>
    %cst_104 = arith.constant dense<0xFF800000> : vector<16xf32>
    %210 = vector.multi_reduction <maximumf>, %209, %cst_104 [1] : vector<16x16xf32> to vector<16xf32>
    %211 = vector.shape_cast %210 : vector<16xf32> to vector<16x1xf32>
    %212 = vector.broadcast %211 : vector<16x1xf32> to vector<16x16xf32>
    %213 = arith.subf %209, %212 : vector<16x16xf32>
    %214 = math.exp %213 : vector<16x16xf32>
    %cst_105 = arith.constant dense<0.000000e+00> : vector<16xf32>
    %215 = vector.multi_reduction <add>, %214, %cst_105 [1] : vector<16x16xf32> to vector<16xf32>
    %216 = vector.shape_cast %215 : vector<16xf32> to vector<16x1xf32>
    %217 = tpu.reciprocal %216 {approx = true} : vector<16x1xf32> -> vector<16x1xf32>
    %218 = vector.broadcast %217 : vector<16x1xf32> to vector<16x16xf32>
    %219 = arith.mulf %214, %218 : vector<16x16xf32>
    %cst_106 = arith.constant dense<0.000000e+00> : vector<16x16xf32>
    %220 = tpu.matmul %219, %207, %cst_106 {dimension_numbers = #tpu.dot_dimension_numbers<[1], [0], [0], [1], [0, 0, 1, 1], [], []>} : vector<16x16xf32>, vector<16x16xf32>, vector<16x16xf32> -> vector<16x16xf32>
    %221 = vector.extract_strided_slice %184 {offsets = [16, 0], sizes = [16, 32], strides = [1, 1]} : vector<32x32xf32> to vector<16x32xf32>
    %cst_107 = arith.constant dense<0.000000e+00> : vector<16x32xf32>
    %222 = tpu.matmul %220, %221, %cst_107 {dimension_numbers = #tpu.dot_dimension_numbers<[1], [0], [0], [1], [0, 0, 1, 1], [], []>} : vector<16x16xf32>, vector<16x32xf32>, vector<16x32xf32> -> vector<16x32xf32>
    %223 = arith.addf %204, %222 : vector<16x32xf32>
    %c1_108 = arith.constant 1 : index
    %c0_109 = arith.constant 0 : index
    %c0_110 = arith.constant 0 : index
    %224 = vector.load %arg13[%c1_108, %c0_109, %c0_110] : memref<2x1x32xf32, #tpu.memory_space<vmem>>, vector<1x1x32xf32>
    %225 = vector.shape_cast %224 : vector<1x1x32xf32> to vector<1x32xf32>
    %226 = vector.broadcast %225 : vector<1x32xf32> to vector<16x32xf32>
    %227 = arith.addf %223, %226 : vector<16x32xf32>
    %228 = arith.addf %227, %175 : vector<16x32xf32>
    %c1_111 = arith.constant 1 : index
    %c0_112 = arith.constant 0 : index
    %c0_113 = arith.constant 0 : index
    %229 = vector.load %arg14[%c1_111, %c0_112, %c0_113] : memref<2x1x32xf32, #tpu.memory_space<vmem>>, vector<1x1x32xf32>
    %230 = vector.shape_cast %229 : vector<1x1x32xf32> to vector<1x32xf32>
    %c1_114 = arith.constant 1 : index
    %c0_115 = arith.constant 0 : index
    %c0_116 = arith.constant 0 : index
    %231 = vector.load %arg15[%c1_114, %c0_115, %c0_116] : memref<2x1x32xf32, #tpu.memory_space<vmem>>, vector<1x1x32xf32>
    %232 = vector.shape_cast %231 : vector<1x1x32xf32> to vector<1x32xf32>
    %cst_117 = arith.constant dense<0.000000e+00> : vector<16xf32>
    %233 = vector.multi_reduction <add>, %228, %cst_117 [1] : vector<16x32xf32> to vector<16xf32>
    %234 = vector.shape_cast %233 : vector<16xf32> to vector<16x1xf32>
    %cst_118 = arith.constant 3.200000e+01 : f32
    %235 = vector.broadcast %cst_118 : f32 to vector<16x1xf32>
    %236 = arith.divf %234, %235 : vector<16x1xf32>
    %237 = vector.broadcast %236 : vector<16x1xf32> to vector<16x32xf32>
    %238 = arith.subf %228, %237 : vector<16x32xf32>
    %239 = arith.mulf %238, %238 : vector<16x32xf32>
    %cst_119 = arith.constant dense<0.000000e+00> : vector<16xf32>
    %240 = vector.multi_reduction <add>, %239, %cst_119 [1] : vector<16x32xf32> to vector<16xf32>
    %241 = vector.shape_cast %240 : vector<16xf32> to vector<16x1xf32>
    %cst_120 = arith.constant 3.200000e+01 : f32
    %242 = vector.broadcast %cst_120 : f32 to vector<16x1xf32>
    %243 = arith.divf %241, %242 : vector<16x1xf32>
    %244 = vector.broadcast %236 : vector<16x1xf32> to vector<16x32xf32>
    %245 = arith.subf %228, %244 : vector<16x32xf32>
    %cst_121 = arith.constant 9.99999996E-13 : f32
    %246 = vector.broadcast %cst_121 : f32 to vector<16x1xf32>
    %247 = arith.addf %243, %246 : vector<16x1xf32>
    %248 = math.rsqrt %247 : vector<16x1xf32>
    %249 = vector.broadcast %248 : vector<16x1xf32> to vector<16x32xf32>
    %250 = arith.mulf %245, %249 : vector<16x32xf32>
    %251 = vector.broadcast %230 : vector<1x32xf32> to vector<16x32xf32>
    %252 = arith.mulf %250, %251 : vector<16x32xf32>
    %253 = vector.broadcast %232 : vector<1x32xf32> to vector<16x32xf32>
    %254 = arith.addf %252, %253 : vector<16x32xf32>
    %c1_122 = arith.constant 1 : index
    %c0_123 = arith.constant 0 : index
    %c0_124 = arith.constant 0 : index
    %255 = vector.load %arg16[%c1_122, %c0_123, %c0_124] : memref<2x32x64xf32, #tpu.memory_space<vmem>>, vector<1x32x64xf32>
    %256 = vector.shape_cast %255 : vector<1x32x64xf32> to vector<32x64xf32>
    %cst_125 = arith.constant dense<0.000000e+00> : vector<16x64xf32>
    %257 = tpu.matmul %254, %256, %cst_125 {dimension_numbers = #tpu.dot_dimension_numbers<[1], [0], [0], [1], [0, 0, 1, 1], [], []>} : vector<16x32xf32>, vector<32x64xf32>, vector<16x64xf32> -> vector<16x64xf32>
    %c1_126 = arith.constant 1 : index
    %c0_127 = arith.constant 0 : index
    %c0_128 = arith.constant 0 : index
    %258 = vector.load %arg17[%c1_126, %c0_127, %c0_128] : memref<2x1x64xf32, #tpu.memory_space<vmem>>, vector<1x1x64xf32>
    %259 = vector.shape_cast %258 : vector<1x1x64xf32> to vector<1x64xf32>
    %260 = vector.broadcast %259 : vector<1x64xf32> to vector<16x64xf32>
    %261 = arith.addf %257, %260 : vector<16x64xf32>
    %cst_129 = arith.constant 5.000000e-01 : f32
    %262 = vector.broadcast %cst_129 : f32 to vector<16x64xf32>
    %263 = arith.mulf %262, %261 : vector<16x64xf32>
    %cst_130 = arith.constant 0.707106769 : f32
    %264 = vector.broadcast %cst_130 : f32 to vector<16x64xf32>
    %265 = arith.mulf %261, %264 : vector<16x64xf32>
    %266 = math.erf %265 : vector<16x64xf32>
    %cst_131 = arith.constant 1.000000e+00 : f32
    %267 = vector.broadcast %cst_131 : f32 to vector<16x64xf32>
    %268 = arith.addf %267, %266 : vector<16x64xf32>
    %269 = arith.mulf %263, %268 : vector<16x64xf32>
    %c1_132 = arith.constant 1 : index
    %c0_133 = arith.constant 0 : index
    %c0_134 = arith.constant 0 : index
    %270 = vector.load %arg18[%c1_132, %c0_133, %c0_134] : memref<2x64x32xf32, #tpu.memory_space<vmem>>, vector<1x64x32xf32>
    %271 = vector.shape_cast %270 : vector<1x64x32xf32> to vector<64x32xf32>
    %cst_135 = arith.constant dense<0.000000e+00> : vector<16x32xf32>
    %272 = tpu.matmul %269, %271, %cst_135 {dimension_numbers = #tpu.dot_dimension_numbers<[1], [0], [0], [1], [0, 0, 1, 1], [], []>} : vector<16x64xf32>, vector<64x32xf32>, vector<16x32xf32> -> vector<16x32xf32>
    %c1_136 = arith.constant 1 : index
    %c0_137 = arith.constant 0 : index
    %c0_138 = arith.constant 0 : index
    %273 = vector.load %arg19[%c1_136, %c0_137, %c0_138] : memref<2x1x32xf32, #tpu.memory_space<vmem>>, vector<1x1x32xf32>
    %274 = vector.shape_cast %273 : vector<1x1x32xf32> to vector<1x32xf32>
    %275 = vector.broadcast %274 : vector<1x32xf32> to vector<16x32xf32>
    %276 = arith.addf %272, %275 : vector<16x32xf32>
    %277 = arith.addf %276, %254 : vector<16x32xf32>
    %c1_139 = arith.constant 1 : index
    %c0_140 = arith.constant 0 : index
    %c0_141 = arith.constant 0 : index
    %278 = vector.load %arg20[%c1_139, %c0_140, %c0_141] : memref<2x1x32xf32, #tpu.memory_space<vmem>>, vector<1x1x32xf32>
    %279 = vector.shape_cast %278 : vector<1x1x32xf32> to vector<1x32xf32>
    %c1_142 = arith.constant 1 : index
    %c0_143 = arith.constant 0 : index
    %c0_144 = arith.constant 0 : index
    %280 = vector.load %arg21[%c1_142, %c0_143, %c0_144] : memref<2x1x32xf32, #tpu.memory_space<vmem>>, vector<1x1x32xf32>
    %281 = vector.shape_cast %280 : vector<1x1x32xf32> to vector<1x32xf32>
    %cst_145 = arith.constant dense<0.000000e+00> : vector<16xf32>
    %282 = vector.multi_reduction <add>, %277, %cst_145 [1] : vector<16x32xf32> to vector<16xf32>
    %283 = vector.shape_cast %282 : vector<16xf32> to vector<16x1xf32>
    %cst_146 = arith.constant 3.200000e+01 : f32
    %284 = vector.broadcast %cst_146 : f32 to vector<16x1xf32>
    %285 = arith.divf %283, %284 : vector<16x1xf32>
    %286 = vector.broadcast %285 : vector<16x1xf32> to vector<16x32xf32>
    %287 = arith.subf %277, %286 : vector<16x32xf32>
    %288 = arith.mulf %287, %287 : vector<16x32xf32>
    %cst_147 = arith.constant dense<0.000000e+00> : vector<16xf32>
    %289 = vector.multi_reduction <add>, %288, %cst_147 [1] : vector<16x32xf32> to vector<16xf32>
    %290 = vector.shape_cast %289 : vector<16xf32> to vector<16x1xf32>
    %cst_148 = arith.constant 3.200000e+01 : f32
    %291 = vector.broadcast %cst_148 : f32 to vector<16x1xf32>
    %292 = arith.divf %290, %291 : vector<16x1xf32>
    %293 = vector.broadcast %285 : vector<16x1xf32> to vector<16x32xf32>
    %294 = arith.subf %277, %293 : vector<16x32xf32>
    %cst_149 = arith.constant 9.99999996E-13 : f32
    %295 = vector.broadcast %cst_149 : f32 to vector<16x1xf32>
    %296 = arith.addf %292, %295 : vector<16x1xf32>
    %297 = math.rsqrt %296 : vector<16x1xf32>
    %298 = vector.broadcast %297 : vector<16x1xf32> to vector<16x32xf32>
    %299 = arith.mulf %294, %298 : vector<16x32xf32>
    %300 = vector.broadcast %279 : vector<1x32xf32> to vector<16x32xf32>
    %301 = arith.mulf %299, %300 : vector<16x32xf32>
    %302 = vector.broadcast %281 : vector<1x32xf32> to vector<16x32xf32>
    %303 = arith.addf %301, %302 : vector<16x32xf32>
    %304 = tpu.iota {dimensions = array<i32: 0>} : vector<2x16xi32>
    %305 = tpu.iota {dimensions = array<i32: 1>} : vector<2x16xi32>
    %c8_i32 = arith.constant 8 : i32
    %306 = vector.broadcast %c8_i32 : i32 to vector<2x16xi32>
    %307 = arith.muli %304, %306 : vector<2x16xi32>
    %308 = arith.cmpi eq, %305, %307 : vector<2x16xi32>
    %309 = arith.extui %308 : vector<2x16xi1> to vector<2x16xi32>
    %310 = arith.sitofp %309 : vector<2x16xi32> to vector<2x16xf32>
    %cst_150 = arith.constant dense<0.000000e+00> : vector<2x32xf32>
    %311 = tpu.matmul %310, %303, %cst_150 {dimension_numbers = #tpu.dot_dimension_numbers<[1], [0], [0], [1], [0, 0, 1, 1], [], []>} : vector<2x16xf32>, vector<16x32xf32>, vector<2x32xf32> -> vector<2x32xf32>
    %c0_151 = arith.constant 0 : index
    %c0_152 = arith.constant 0 : index
    %312 = vector.load %arg22[%c0_151, %c0_152] : memref<32x32xf32, #tpu.memory_space<vmem>>, vector<32x32xf32>
    %cst_153 = arith.constant dense<0.000000e+00> : vector<2x32xf32>
    %313 = tpu.matmul %311, %312, %cst_153 {dimension_numbers = #tpu.dot_dimension_numbers<[1], [0], [0], [1], [0, 0, 1, 1], [], []>} : vector<2x32xf32>, vector<32x32xf32>, vector<2x32xf32> -> vector<2x32xf32>
    %c0_154 = arith.constant 0 : index
    %c0_155 = arith.constant 0 : index
    %314 = vector.load %arg23[%c0_154, %c0_155] : memref<1x32xf32, #tpu.memory_space<vmem>>, vector<1x32xf32>
    %315 = vector.broadcast %314 : vector<1x32xf32> to vector<2x32xf32>
    %316 = arith.addf %313, %315 : vector<2x32xf32>
    %317 = math.tanh %316 : vector<2x32xf32>
    %c0_156 = arith.constant 0 : index
    %c0_157 = arith.constant 0 : index
    %318 = vector.load %arg24[%c0_156, %c0_157] : memref<32x2xf32, #tpu.memory_space<vmem>>, vector<32x2xf32>
    %cst_158 = arith.constant dense<0.000000e+00> : vector<2x2xf32>
    %319 = tpu.matmul %317, %318, %cst_158 {dimension_numbers = #tpu.dot_dimension_numbers<[1], [0], [0], [1], [0, 0, 1, 1], [], []>} : vector<2x32xf32>, vector<32x2xf32>, vector<2x2xf32> -> vector<2x2xf32>
    %c0_159 = arith.constant 0 : index
    %c0_160 = arith.constant 0 : index
    %320 = vector.load %arg25[%c0_159, %c0_160] : memref<1x2xf32, #tpu.memory_space<vmem>>, vector<1x2xf32>
    %321 = vector.broadcast %320 : vector<1x2xf32> to vector<2x2xf32>
    %322 = arith.addf %319, %321 : vector<2x2xf32>
    %c0_161 = arith.constant 0 : index
    %c0_162 = arith.constant 0 : index
    %323 = vector.load %arg26[%c0_161, %c0_162] : memref<2x2xf32, #tpu.memory_space<vmem>>, vector<2x2xf32>
    tpu.vector_store %arg26[%c0_161, %c0_162], %322 {strides = array<i32>} : memref<2x2xf32, #tpu.memory_space<vmem>>, vector<2x2xf32>,
    %cst_163 = arith.constant dense<0xFF800000> : vector<2xf32>
    %324 = vector.multi_reduction <maximumf>, %322, %cst_163 [1] : vector<2x2xf32> to vector<2xf32>
    %325 = vector.shape_cast %324 : vector<2xf32> to vector<2x1xf32>
    %326 = vector.broadcast %325 : vector<2x1xf32> to vector<2x2xf32>
    %327 = arith.subf %322, %326 : vector<2x2xf32>
    %328 = math.exp %327 : vector<2x2xf32>
    %cst_164 = arith.constant dense<0.000000e+00> : vector<2xf32>
    %329 = vector.multi_reduction <add>, %328, %cst_164 [1] : vector<2x2xf32> to vector<2xf32>
    %330 = vector.shape_cast %329 : vector<2xf32> to vector<2x1xf32>
    %331 = math.log %330 : vector<2x1xf32>
    %332 = arith.addf %331, %325 : vector<2x1xf32>
    %333 = vector.broadcast %332 : vector<2x1xf32> to vector<2x2xf32>
    %334 = arith.subf %322, %333 : vector<2x2xf32>
    %335 = tpu.iota {dimensions = array<i32: 1>} : vector<2x2xi32>
    %c0_165 = arith.constant 0 : index
    %c0_166 = arith.constant 0 : index
    %336 = vector.load %arg2[%c0_165, %c0_166] : memref<2x1xi32, #tpu.memory_space<vmem>>, vector<2x1xi32>
    %337 = vector.broadcast %336 : vector<2x1xi32> to vector<2x2xi32>
    %338 = arith.cmpi eq, %335, %337 : vector<2x2xi32>
    %339 = arith.extui %338 : vector<2x2xi1> to vector<2x2xi32>
    %340 = arith.sitofp %339 : vector<2x2xi32> to vector<2x2xf32>
    %341 = arith.mulf %340, %334 : vector<2x2xf32>
    %cst_167 = arith.constant dense<0.000000e+00> : vector<2xf32>
    %342 = vector.multi_reduction <add>, %341, %cst_167 [1] : vector<2x2xf32> to vector<2xf32>
    %343 = vector.shape_cast %342 : vector<2xf32> to vector<2x1xf32>
    %cst_168 = arith.constant 0.000000e+00 : f32
    %344 = vector.broadcast %cst_168 : f32 to vector<2x1xf32>
    %345 = arith.subf %344, %343 : vector<2x1xf32>
    %346 = vector.shape_cast %345 : vector<2x1xf32> to vector<1x2x1xf32>
    %cst_169 = arith.constant dense<0.000000e+00> : vector<1xf32>
    %347 = vector.multi_reduction <add>, %346, %cst_169 [1, 2] : vector<1x2x1xf32> to vector<1xf32>
    %348 = vector.shape_cast %347 : vector<1xf32> to vector<1x1x1xf32>
    %349 = vector.extract %348[0, 0, 0] : f32 from vector<1x1x1xf32>
    %350 = vector.broadcast %349 : f32 to vector<1x1xf32>
    %cst_170 = arith.constant 5.000000e-01 : f32
    %351 = vector.broadcast %cst_170 : f32 to vector<1x1xf32>
    %352 = arith.mulf %350, %351 : vector<1x1xf32>
    %c0_171 = arith.constant 0 : index
    %c0_172 = arith.constant 0 : index
    %353 = vector.load %arg27[%c0_171, %c0_172] : memref<1x1xf32, #tpu.memory_space<vmem>>, vector<1x1xf32>
    tpu.vector_store %arg27[%c0_171, %c0_172], %352 {strides = array<i32>} : memref<1x1xf32, #tpu.memory_space<vmem>>, vector<1x1xf32>,
    return
  }
}

</mosaic_0001>

<bundles_post_ra>
// kernel: decoder_forward.1
= control target key start
LH: loop header
LB: loop body
LE: loop exit
PB: predicated region body
PF: predicated region fallthrough
CT: control target
= control target key end

     0   :  { %s2594_s0 = inlined_call_operand.vmem [shape: s32[16,1], index: 0, kind: input, shape index: {}]   ;;  %s2595_s1 = inlined_call_operand.vmem [shape: f32[1,16], index: 1, kind: input, shape index: {}]   ;;  %s2596_s2 = inlined_call_operand.vmem [shape: s32[2,1], index: 2, kind: input, shape index: {}]   ;;  %s2597_s3 = inlined_call_operand.vmem [shape: f32[16,16], index: 3, kind: input, shape index: {}]   ;;  %s2598_s4 = inlined_call_operand.vmem [shape: f32[16,16], index: 4, kind: input, shape index: {}]   ;;  %s2599_s5 = inlined_call_operand.vmem [shape: f32[100,32], index: 5, kind: input, shape index: {}]   ;;  %s2600_s6 = inlined_call_operand.vmem [shape: f32[16,32], index: 6, kind: input, shape index: {}]   ;;  %s2601_s7 = inlined_call_operand.vmem [shape: f32[2,32], index: 7, kind: input, shape index: {}]   ;;  %s2602_s8 = inlined_call_operand.vmem [shape: f32[1,32], index: 8, kind: input, shape index: {}]   ;;  %s2603_s9 = inlined_call_operand.hbm [shape: f32[1,32], index: 9, kind: input, shape index: {}]   ;;  %s2604_s10 = inlined_call_operand.vmem [shape: f32[2,32,96], index: 10, kind: input, shape index: {}]   ;;  %s2605_s11 = inlined_call_operand.vmem [shape: f32[2,1,96], index: 11, kind: input, shape index: {}]   ;;  %s2606_s12 = inlined_call_operand.vmem [shape: f32[2,32,32], index: 12, kind: input, shape index: {}]   ;;  %s2607_s13 = inlined_call_operand.vmem [shape: f32[2,1,32], index: 13, kind: input, shape index: {}]   ;;  %s2608_s14 = inlined_call_operand.vmem [shape: f32[2,1,32], index: 14, kind: input, shape index: {}]   ;;  %s2609_s15 = inlined_call_operand.vmem [shape: f32[2,1,32], index: 15, kind: input, shape index: {}]   ;;  %s2610_s16 = inlined_call_operand.vmem [shape: f32[2,32,64], index: 16, kind: input, shape index: {}]   ;;  %s2611_s17 = inlined_call_operand.vmem [shape: f32[2,1,64], index: 17, kind: input, shape index: {}]   ;;  %s2612_s18 = inlined_call_operand.vmem [shape: f32[2,64,32], index: 18, kind: input, shape index: {}]   ;;  %s2613_s19 = inlined_call_operand.vmem [shape: f32[2,1,32], index: 19, kind: input, shape index: {}]   ;;  %s2614_s20 = inlined_call_operand.vmem [shape: f32[2,1,32], index: 20, kind: input, shape index: {}]   ;;  %s2615_s21 = inlined_call_operand.vmem [shape: f32[2,1,32], index: 21, kind: input, shape index: {}]   ;;  %s2616_s22 = inlined_call_operand.vmem [shape: f32[32,32], index: 22, kind: input, shape index: {}]   ;;  %s2617_s23 = inlined_call_operand.vmem [shape: f32[1,32], index: 23, kind: input, shape index: {}]   ;;  %s2618_s24 = inlined_call_operand.vmem [shape: f32[32,2], index: 24, kind: input, shape index: {}]   ;;  %s2619_s25 = inlined_call_operand.hbm [shape: f32[1,2], index: 25, kind: input, shape index: {}]   ;;  %s2620_s26 = inlined_call_operand.hbm [shape: f32[2,2], index: 26, kind: output, shape index: {0}]   ;;  %s2621_s27 = inlined_call_operand.hbm [shape: f32[1,1], index: 27, kind: output, shape index: {1}]  }
   0x1   :  { %2629 = sst [smem:[#allocation14_spill]] %s2594_s0 }
   0x2   :  { %2630 = sst [smem:[#allocation15_spill]] %s2595_s1 }
   0x3   :  { %2631 = sst [smem:[#allocation16_spill]] %s2596_s2 }
   0x4   :  { %2632 = sst [smem:[#allocation17_spill]] %s2597_s3 }
   0x5   :  { %2633 = sst [smem:[#allocation18_spill]] %s2598_s4 }
   0x6   :  { %2634 = sst [smem:[#allocation19_spill]] %s2599_s5 }
   0x7   :  { %2635 = sst [smem:[#allocation20_spill]] %s2600_s6 }
   0x8   :  { %2636 = sst [smem:[#allocation21_spill]] %s2601_s7 }
   0x9   :  { %2637 = sst [smem:[#allocation22_spill]] %s2602_s8 }
   0xa   :  { %2638 = sst [smem:[#allocation23_spill]] %s2603_s9 }
   0xb   :  { %2639 = sst [smem:[#allocation24_spill]] %s2604_s10 }
   0xc   :  { %2640 = sst [smem:[#allocation25_spill]] %s2605_s11 }
   0xd   :  { %33 = vsyncpa [#allocation3], 0 }
   0xe   :  { %34 = vsyncpa [#allocation6], 0 }
   0xf   :  { %35 = vsyncpa [#allocation4], 0 }
  0x10   :  { %36 = vsyncpa [#allocation9], 0  ;;  %s2641_s8 = sld [smem:[#allocation23_spill]]  ;;  %s1941_s9 = smov [#allocation2]  }
  0x11   :  { %s62_s5 = sshll.u32 %s1941_s9, 4  ;;  %s101_s10 = sshll.u32 %s2619_s25, 4  ;;  %s63_s5 = int_to_ptr.vmem [resolvable:$true] %s62_s5  ;;  %s102_s10 = int_to_ptr.hbm [resolvable:$true] %s101_s10 }
  0x12   :  { %s1942_s29 = smov [#allocation5]  }
  0x13   :  { %s103_s1 = sshll.u32 %s1942_s29, 4  ;;  %s104_s1 = int_to_ptr.vmem [resolvable:$true] %s103_s1 }
  0x14   :  { %106 = dma.hbm_to_vmem [thread:$0]  %s102_s10, 16, %s104_s1, [#allocation6]  }
  0x16   :  { %s60_s30 = sshll.u32 %s2641_s8, 4  ;;  %s61_s30 = int_to_ptr.hbm [resolvable:$true] %s60_s30 }
  0x17   :  { %65 = dma.hbm_to_vmem [thread:$0]  %s61_s30, 16, %s63_s5, [#allocation3]  }
  0x18   :  { %1933 = dma.done.wait [#allocation3], 16  }
  0x19   :  { %1934 = vsyncadd [#allocation3], 4294967280 }
  0x1a   :  { %1935 = dma.done.wait [#allocation6], 16  }
  0x1b   :  { %1936 = vsyncadd [#allocation6], 4294967280  ;;  %v1943_v0 = vmov 0   ;;  %vm186_vm0 = vcmask 1043456   ;;  %s2642_s2 = sld [smem:[#allocation14_spill]]  ;;  %vm148_vm1 = vcmask 130048   ;;  %v115_v20 = vlaneseq }
  0x1c   :  { %1727 = vset.pattern.permute.xlu0 %v1943_v0  ;;  %1748 = vset.pattern.permute.xlu2 %v1943_v0  ;;  %s2643_s7 = sld [smem:[#allocation19_spill]]  ;;  %vm179_vm2 = vcmask 818176   ;;  %v1944_v23 = vmov 0.0   ;;  %vm218_vm5 = vcmask 261120   ;;  %v1945_v39 = vmov 32.0   ;;  %s1947_s29 = smov 80  }
  0x1d   :  { %s2644_s3 = sld [smem:[#allocation20_spill]]  ;;  %v2159_v21 = vand.u32 127, %v115_v20  ;;  %1769 = vrcp.f32 %v1945_v39  ;;  %s1948_s1 = smov 112  }
  0x1e   :  { %s2645_s5 = sld [smem:[#allocation17_spill]]  ;;  %s1950_s0 = smov 48  }
  0x1f   :  { %s2646_s10 = sld [smem:[#allocation21_spill]] }
  0x20   :  { %s2647_s6 = sld [smem:[#allocation24_spill]] }
  0x21   :  { %v117_v1 = vld [vmem:[%s2642_s2] sm:$0xff]  ;;  %v118_v5 = vld [vmem:[%s2642_s2 + $0x8] sm:$0xff]  ;;  %s2648_s28 = sld [smem:[#allocation22_spill]] }
  0x22   :  { %v143_v2 = vld [vmem:[%s2643_s7 + $0x60] sm:$0xf]  ;;  %120 = vperm.xlu0 %1727, %v117_v1   ;;  %v142_v3 = vld [vmem:[%s2643_s7 + $0x58] sm:$0xff]  ;;  %v141_v4 = vld [vmem:[%s2643_s7 + $0x50] sm:$0xff]  ;;  %s2650_s4 = sld [smem:[#allocation15_spill]] }
  0x23   :  { %1629 = vmatpush.msk.msra.mxu1 %vm186_vm0, %v143_v2  ;;  %v140_v6 = vld [vmem:[%s2643_s7 + $0x48] sm:$0xff]  ;;  %v139_v7 = vld [vmem:[%s2643_s7 + $0x40] sm:$0xff]  ;;  %v138_v9 = vld [vmem:[%s2643_s7 + $0x38] sm:$0xff]  ;;  %v1770_v40 = vpop.eup %1769  ;;  %s2651_s30 = sld [smem:[#allocation18_spill]] }
  0x24   :  { %v147_v8 = vld [vmem:[%s2644_s3 + $0x8] sm:$0xff]  ;;  %v137_v10 = vld [vmem:[%s2643_s7 + $0x30] sm:$0xff]  ;;  %v135_v12 = vld [vmem:[%s2643_s7 + $0x20] sm:$0xff]  ;;  %v226_v41 = vmul.f32 32.0, %v1770_v40  ;;  %vm230_vm6 = vweird.f32 %v1770_v40 }
  0x25   :  { %194 = vmatpush.msra.mxu1 %v142_v3  ;;  %169 = vmatpush.msra.mxu0 %v147_v8  ;;  %v136_v11 = vld [vmem:[%s2643_s7 + $0x28] sm:$0xff]  ;;  %v134_v13 = vld [vmem:[%s2643_s7 + $0x18] sm:$0xff]  ;;  %v133_v14 = vld [vmem:[%s2643_s7 + $0x10] sm:$0xff] }
  0x26   :  { %v132_v15 = vld [vmem:[%s2643_s7 + $0x8] sm:$0xff]  ;;  %v146_v16 = vld [vmem:[%s2644_s3] sm:$0xff]  ;;  %v227_v42 = vsub.f32 1.0, %v226_v41  ;;  %v293_v56 = vld [vmem:[%s2647_s6 + $0x18] sm:$0xff]  ;;  %s2649_s3 = sld [smem:[#allocation25_spill]] }
  0x27   :  { %195 = vmatpush.msra.mxu1 %v141_v4  ;;  %v131_v17 = vld [vmem:[%s2643_s7] sm:$0xff]  ;;  %170 = vmatpush.msra.mxu0 %v146_v16  ;;  %v145_v19 = vld [vmem:[%s2645_s5 + $0x8] sm:$0xff]  ;;  %v292_v57 = vld [vmem:[%s2647_s6 + $0x10] sm:$0xff] }
  0x28   :  { %v144_v18 = vld [vmem:[%s2645_s5] sm:$0xff]  ;;  %v228_v43 = vmul.f32 %v1770_v40, %v227_v42  ;;  %316 = vmatpush.msra.mxu2 %v293_v56  ;;  %v291_v58 = vld [vmem:[%s2647_s6 + $0x8] sm:$0xff]  ;;  %s2652_s5 = sld [smem:[#allocation16_spill]] }
  0x29   :  { %196 = vmatpush.msra.mxu1 %v140_v6  ;;  %1627 = vmatmul.msk.f32.vlgmr.msra.gmra.mxu0 %vm148_vm1, %v144_v18  ;;  %v178_v28 = vld [vmem:[%s2646_s10] sm:$0x3]  ;;  %s1946_s10 = smov 96  }
  0x2a   :  { %123 = vperm.xlu0 %1727, %v118_v5   ;;  %v213_v29 = vperm.slane %v178_v28, 0  ;;  %v229_v44 = vadd.f32 %v1770_v40, %v228_v43  ;;  %317 = vmatpush.msra.mxu2 %v292_v57  ;;  %v290_v59 = vld [vmem:[%s2647_s6] sm:$0xff] }
  0x2b   :  { %197 = vmatpush.msra.mxu1 %v139_v7  ;;  %v283_v42 = vld [vmem:[%s2651_s30] sm:$0xff] }
  0x2c   :  { %v2170_v45 = vsel %vm230_vm6, %v1770_v40, %v229_v44  ;;  %318 = vmatpush.msra.mxu2 %v291_v58 }
  0x2d   :  { %198 = vmatpush.msra.mxu1 %v138_v9 }
  0x2e   :  { %319 = vmatpush.msra.mxu2 %v290_v59 }
  0x2f   :  { %199 = vmatpush.msra.mxu1 %v137_v10  ;;  %v1749_v10 = vld [vmem:[%s2648_s28] ss:$0 sm:$0xff]  ;;  %s1949_s28 = smov 64  }
  0x31   :  { %200 = vmatpush.msra.mxu1 %v136_v11  ;;  %1628 = vmatmul.msk.f32.gmra.mxu0 %vm148_vm1, %v145_v19 }
  0x33   :  { %201 = vmatpush.msra.mxu1 %v135_v12 }
  0x35   :  { %202 = vmatpush.msra.mxu1 %v134_v13 }
  0x37   :  { %203 = vmatpush.msra.mxu1 %v133_v14  ;;  %v1750_v14 = vld [vmem:[#allocation2] ss:$0 sm:$0xff] }
  0x39   :  { %204 = vmatpush.msra.mxu1 %v132_v15 }
  0x3b   :  { %205 = vmatpush.msra.mxu1 %v131_v17 }
  0x94   :  { %v121_v22 = vpop.permute.xlu0 %120 }
  0x95   :  { %vm125_vm3 = vcmp.eq.s32.totalorder %v2159_v21, %v121_v22 }
  0x96   :  { %v1625_v24 = vsel %vm125_vm3, 1.0, %v1944_v23 }
  0x97   :  { %1630 = vmatmul.msk.f32.vlgmr.msra.gmra.mxu1 %vm179_vm2, %v1625_v24 }
  0x9c   :  { %v124_v25 = vpop.permute.xlu0 %123 }
  0x9d   :  { %vm126_vm4 = vcmp.eq.s32.totalorder %v2159_v21, %v124_v25 }
  0x9e   :  { %v1626_v26 = vsel %vm126_vm4, 1.0, %v1944_v23 }
  0x9f   :  { %1631 = vmatmul.msk.f32.gmra.mxu1 %vm179_vm2, %v1626_v26 }
  0xa6   :  { %v172_v27 = vpop.f32.mrf.mxu0 }
  0xae   :  { %v175_v34 = vpop.f32.mrf.mxu0 }
 0x114   :  { %v207_v30 = vpop.f32.mrf.mxu1 }
 0x115   :  { %v208_v31 = vadd.f32 %v207_v30, %v172_v27  ;;  %v1751_v27 = vld [vmem:[%s2649_s3] ss:$0 sm:$0xff] }
 0x117   :  { %v214_v32 = vadd.f32 %v213_v29, %v208_v31 }
 0x119   :  { %v219_v33 = vsel %vm218_vm5, %v214_v32, 0.0 }
 0x11a   :  { %220 = vadd.xlane.f32.xlu1 %v219_v33 }
 0x11c   :  { %v210_v35 = vpop.f32.mrf.mxu1 }
 0x11d   :  { %v211_v36 = vadd.f32 %v210_v35, %v175_v34 }
 0x11f   :  { %v215_v37 = vadd.f32 %v213_v29, %v211_v36 }
 0x121   :  { %v222_v38 = vsel %vm218_vm5, %v215_v37, 0.0 }
 0x122   :  { %223 = vadd.xlane.f32.xlu1 %v222_v38  ;;  %v280_v38 = vld [vmem:[%s2650_s4] sm:$0x1] }
 0x123   :  { %v281_v39 = vsub.f32 1.0, %v280_v38 }
 0x125   :  { %v282_v40 = vmul.f32 -10000.0, %v281_v39 }
 0x127   :  { %v286_v41 = vperm.slane %v282_v40, 0  ;;  %v327_v40 = vld [vmem:[%s2606_s12] sm:$0xff] }
 0x129   :  { %v2224_v43 = vadd.f32 %v286_v41, %v283_v42  ;;  %v329_v42 = vld [vmem:[%s2606_s12 + $0x10] sm:$0xff] }
 0x18d   :  { %v221_v46 = vpop.xlane.xlu1 %220 }
 0x18e   :  { %v232_v47 = vmul.f32 %v2170_v45, %v221_v46 }
 0x190   :  { %v234_v48 = vsub.f32 %v214_v32, %v232_v47  ;;  %v284_v47 = vld [vmem:[%s2651_s30 + $0x8] sm:$0xff] }
 0x192   :  { %v236_v49 = vmul.f32 %v234_v48, %v234_v48 }
 0x194   :  { %v238_v50 = vsel %vm218_vm5, %v236_v49, 0.0  ;;  %v2231_v49 = vadd.f32 %v286_v41, %v284_v47  ;;  %v330_v41 = vld [vmem:[%s2606_s12 + $0x18] sm:$0xff] }
 0x195   :  { %239 = vadd.xlane.f32.xlu2 %v238_v50  ;;  %v224_v51 = vpop.xlane.xlu1 %223 }
 0x196   :  { %v233_v52 = vmul.f32 %v2170_v45, %v224_v51 }
 0x198   :  { %v235_v53 = vsub.f32 %v215_v37, %v233_v52 }
 0x19a   :  { %v237_v54 = vmul.f32 %v235_v53, %v235_v53 }
 0x19c   :  { %v241_v55 = vsel %vm218_vm5, %v237_v54, 0.0 }
 0x19d   :  { %242 = vadd.xlane.f32.xlu2 %v241_v55 }
 0x208   :  { %v240_v60 = vpop.xlane.xlu2 %239 }
 0x209   :  { %v244_v61 = vmul.f32 %v240_v60, %v2170_v45 }
 0x20b   :  { %v246_v62 = vadd.f32 1e-12, %v244_v61 }
 0x20d   :  { %1771 = vrsqrt.f32 %v246_v62  ;;  %vm254_vm8 = vweird.f32 %v246_v62 }
 0x210   :  { %v243_v63 = vpop.xlane.xlu2 %242 }
 0x211   :  { %v245_v0 = vmul.f32 %v243_v63, %v2170_v45 }
 0x213   :  { %v1772_v1 = vpop.eup %1771  ;;  %v247_v2 = vadd.f32 1e-12, %v245_v0 }
 0x214   :  { %v249_v3 = vmul.f32 %v1772_v1, %v246_v62  ;;  %vm255_vm7 = vweird.f32 %v1772_v1 }
 0x215   :  { %1773 = vrsqrt.f32 %v247_v2  ;;  %vm256_vm9 = vmor %vm254_vm8, %vm255_vm7  ;;  %vm264_vm11 = vweird.f32 %v247_v2 }
 0x216   :  { %v250_v4 = vmul.f32 %v1772_v1, %v249_v3 }
 0x218   :  { %v251_v5 = vmul.f32 0.5, %v250_v4 }
 0x21a   :  { %v252_v6 = vsub.f32 1.5, %v251_v5 }
 0x21b   :  { %v1774_v7 = vpop.eup %1773 }
 0x21c   :  { %v253_v8 = vmul.f32 %v1772_v1, %v252_v6  ;;  %v259_v9 = vmul.f32 %v1774_v7, %v247_v2  ;;  %vm265_vm10 = vweird.f32 %v1774_v7 }
 0x21d   :  { %vm266_vm12 = vmor %vm264_vm11, %vm265_vm10  ;;  %vm780_vm11 = vcmask 523264  }
 0x21e   :  { %v257_v11 = vsel %vm256_vm9, %v1772_v1, %v253_v8  ;;  %v260_v12 = vmul.f32 %v1774_v7, %v259_v9 }
 0x21f   :  { %v268_v13 = vmul.f32 %v257_v11, %v234_v48 }
 0x220   :  { %v261_v15 = vmul.f32 0.5, %v260_v12 }
 0x221   :  { %v273_v16 = vmul.f32 %v1749_v10, %v268_v13 }
 0x222   :  { %v262_v17 = vsub.f32 1.5, %v261_v15 }
 0x223   :  { %v2193_v18 = vadd.f32 %v1750_v14, %v273_v16 }
 0x224   :  { %v263_v19 = vmul.f32 %v1774_v7, %v262_v17 }
 0x225   :  { %1632 = vmatmul.msk.f32.vlgmr.msra.gmra.mxu2 %vm218_vm5, %v2193_v18 }
 0x226   :  { %v267_v22 = vsel %vm266_vm12, %v1774_v7, %v263_v19 }
 0x227   :  { %v269_v24 = vmul.f32 %v267_v22, %v235_v53 }
 0x229   :  { %v274_v25 = vmul.f32 %v1749_v10, %v269_v24  ;;  %v328_v24 = vld [vmem:[%s2606_s12 + $0x8] sm:$0xff] }
 0x22b   :  { %v2197_v26 = vadd.f32 %v1750_v14, %v274_v25 }
 0x22d   :  { %1633 = vmatmul.msk.f32.gmra.mxu2 %vm218_vm5, %v2197_v26 }
 0x2a8   :  { %v321_v28 = vpop.f32.mrf.mxu2 }
 0x2a9   :  { %v322_v29 = vadd.f32 %v1751_v27, %v321_v28 }
 0x2ab   :  { %333 = vrot.lane.b32.xlu2 %v322_v29, %s1946_s10 }
 0x2b0   :  { %v324_v30 = vpop.f32.mrf.mxu2 }
 0x2b1   :  { %v325_v31 = vadd.f32 %v1751_v27, %v324_v30 }
 0x2b3   :  { %431 = vrot.lane.b32.xlu1 %v325_v31, %s1947_s29  ;;  %335 = vrot.lane.b32.xlu0 %v325_v31, %s1946_s10  ;;  %v1728_v59 = vpack.i.bf16 %v322_v29, %v325_v31 }
 0x2bb   :  { %429 = vrot.lane.b32.xlu0 %v322_v29, %s1947_s29 }
 0x2c3   :  { %425 = vrot.lane.b32.xlu0 %v322_v29, %s1948_s1 }
 0x2cb   :  { %427 = vrot.lane.b32.xlu0 %v325_v31, %s1948_s1 }
 0x305   :  { %v334_v34 = vpop.permute.xlu2 %333 }
 0x325   :  { %v432_v32 = vpop.permute.xlu1 %431  ;;  %v336_v33 = vpop.permute.xlu0 %335 }
 0x326   :  { %1634 = vmatpush.xpose.msk.msra.mxu3 %vm148_vm1, %v336_v33  ;;  %1640 = vmatpush.xpose.msk.msrb.mxu2 %vm148_vm1, %v432_v32 }
 0x32a   :  { %1635 = vmatpush.xpose.msk.msra.mxu3 %vm148_vm1, %v334_v34 }
 0x32d   :  { %v430_v35 = vpop.permute.xlu0 %429  ;;  %1636 = vmatmul.msk.f32.vlgmr.msra.gmra.mxu3 %vm148_vm1, %v322_v29 }
 0x32e   :  { %1641 = vmatpush.xpose.msk.msrb.mxu2 %vm148_vm1, %v430_v35 }
 0x332   :  { %570 = vmatpush.msra.mxu2 %v328_v24 }
 0x334   :  { %571 = vmatpush.msra.mxu2 %v327_v40 }
 0x335   :  { %v426_v36 = vpop.permute.xlu0 %425  ;;  %1637 = vmatmul.msk.f32.gmra.mxu3 %vm148_vm1, %v325_v31 }
 0x336   :  { %1642 = vmatmul.msk.f32.vlgmr.msrb.gmra.mxu2 %vm148_vm1, %v426_v36 }
 0x33d   :  { %v428_v37 = vpop.permute.xlu0 %427 }
 0x33e   :  { %1643 = vmatmul.msk.f32.gmra.mxu2 %vm148_vm1, %v428_v37 }
 0x3b0   :  { %v362_v44 = vpop.f32.mrf.mxu3 }
 0x3b1   :  { %v363_v46 = vadd.f32 %v362_v44, %v2224_v43 }
 0x3b3   :  { %v368_v48 = vsel %vm148_vm1, %v363_v46, -inf }
 0x3b4   :  { %369 = vmax.xlane.f32.xlu2 %v368_v48 }
 0x3b8   :  { %v365_v50 = vpop.f32.mrf.mxu3 }
 0x3b9   :  { %v366_v51 = vadd.f32 %v365_v50, %v2231_v49  ;;  %v458_v52 = vpop.f32.mrf.mxu2  ;;  %v1752_v50 = vld [vmem:[%s2607_s13] ss:$0 sm:$0xff] }
 0x3ba   :  { %v459_v53 = vadd.f32 %v458_v52, %v2224_v43 }
 0x3bb   :  { %v371_v54 = vsel %vm148_vm1, %v366_v51, -inf }
 0x3bc   :  { %372 = vmax.xlane.f32.xlu0 %v371_v54  ;;  %v464_v55 = vsel %vm148_vm1, %v459_v53, -inf }
 0x3bd   :  { %465 = vmax.xlane.f32.xlu1 %v464_v55 }
 0x3c1   :  { %v461_v56 = vpop.f32.mrf.mxu2 }
 0x3c2   :  { %v462_v57 = vadd.f32 %v461_v56, %v2231_v49 }
 0x3c4   :  { %v467_v58 = vsel %vm148_vm1, %v462_v57, -inf }
 0x3c5   :  { %468 = vmax.xlane.f32.xlu2 %v467_v58 }
 0x3d0   :  { %1729 = vrot.lane.b32.xlu0 %v1728_v59, %s1949_s28 }
 0x427   :  { %v370_v60 = vpop.xlane.xlu2 %369 }
 0x428   :  { %v374_v61 = vsub.f32 %v363_v46, %v370_v60 }
 0x42a   :  { %v376_v62 = vmul.f32 1.442695, %v374_v61 }
 0x42c   :  { %1775 = vpow2.f32 %v376_v62 }
 0x42f   :  { %v373_v63 = vpop.xlane.xlu0 %372 }
 0x430   :  { %v466_v0 = vpop.xlane.xlu1 %465  ;;  %v375_v3 = vsub.f32 %v366_v51, %v373_v63 }
 0x431   :  { %v470_v1 = vsub.f32 %v459_v53, %v466_v0 }
 0x432   :  { %v1776_v2 = vpop.eup %1775  ;;  %v378_v6 = vmul.f32 1.442695, %v375_v3 }
 0x433   :  { %v472_v4 = vmul.f32 1.442695, %v470_v1  ;;  %v380_v5 = vsel %vm148_vm1, %v1776_v2, 0.0 }
 0x434   :  { %381 = vadd.xlane.f32.xlu1 %v380_v5 }
 0x435   :  { %1777 = vpow2.f32 %v472_v4 }
 0x436   :  { %1779 = vpow2.f32 %v378_v6 }
 0x438   :  { %v469_v7 = vpop.xlane.xlu2 %468 }
 0x439   :  { %v471_v9 = vsub.f32 %v462_v57, %v469_v7 }
 0x43b   :  { %v1778_v8 = vpop.eup %1777  ;;  %v474_v11 = vmul.f32 1.442695, %v471_v9  ;;  %v644_v9 = vld [vmem:[%s2610_s16 + $0x8] sm:$0xff] }
 0x43c   :  { %v476_v10 = vsel %vm148_vm1, %v1778_v8, 0.0  ;;  %v1780_v12 = vpop.eup %1779 }
 0x43d   :  { %477 = vadd.xlane.f32.xlu2 %v476_v10  ;;  %1781 = vpow2.f32 %v474_v11  ;;  %v383_v15 = vsel %vm148_vm1, %v1780_v12, 0.0  ;;  %v643_v10 = vld [vmem:[%s2610_s16] sm:$0xff] }
 0x442   :  { %v1730_v13 = vpop.permute.xlu0 %1729 }
 0x443   :  { %v1731_v14 = vunpack.i.l.bf16 %v1730_v13  ;;  %v1732_v16 = vunpack.i.h.bf16 %v1730_v13  ;;  %v1782_v17 = vpop.eup %1781 }
 0x444   :  { %v479_v19 = vsel %vm148_vm1, %v1782_v17, 0.0 }
 0x445   :  { %416 = vmatpush.msrb.mxu0 %v1731_v14  ;;  %384 = vadd.xlane.f32.xlu2 %v383_v15 }
 0x447   :  { %417 = vmatpush.msrb.mxu0 %v1732_v16 }
 0x449   :  { %541 = vmatpush.msra.mxu0 %v330_v41 }
 0x44b   :  { %542 = vmatpush.msra.mxu0 %v329_v42 }
 0x44d   :  { %1734 = vrot.lane.b32.xlu1 %v1728_v59, %s1950_s0  ;;  %480 = vadd.xlane.f32.xlu2 %v479_v19 }
 0x4a7   :  { %v382_v22 = vpop.xlane.xlu1 %381 }
 0x4a8   :  { %1783 = vrcp.f32 %v382_v22 }
 0x4ae   :  { %v1784_v25 = vpop.eup %1783 }
 0x4af   :  { %v388_v27 = vmul.f32 %v1784_v25, %v1776_v2 }
 0x4b0   :  { %v478_v28 = vpop.xlane.xlu2 %477 }
 0x4b1   :  { %1638 = vmatmul.msk.f32.vlgmr.msrb.gmra.mxu0 %vm148_vm1, %v388_v27 }
 0x4b8   :  { %v385_v29 = vpop.xlane.xlu2 %384 }
 0x4b9   :  { %1785 = vrcp.f32 %v385_v29 }
 0x4ba   :  { %1787 = vrcp.f32 %v478_v28 }
 0x4bf   :  { %v1786_v30 = vpop.eup %1785  ;;  %v1735_v31 = vpop.permute.xlu1 %1734 }
 0x4c0   :  { %v1788_v32 = vpop.eup %1787  ;;  %v481_v33 = vpop.xlane.xlu2 %480  ;;  %v389_v34 = vmul.f32 %v1786_v30, %v1780_v12  ;;  %v1736_v35 = vunpack.i.l.bf16 %v1735_v31  ;;  %v1737_v36 = vunpack.i.h.bf16 %v1735_v31  ;;  %v1753_v30 = vld [vmem:[%s2608_s14] ss:$0 sm:$0xff] }
 0x4c1   :  { %1789 = vrcp.f32 %v481_v33  ;;  %v484_v37 = vmul.f32 %v1788_v32, %v1778_v8  ;;  %v645_v8 = vld [vmem:[%s2610_s16 + $0x10] sm:$0xff] }
 0x4c2   :  { %1639 = vmatmul.msk.f32.gmra.mxu0 %vm148_vm1, %v389_v34  ;;  %512 = vmatpush.msrb.mxu3 %v1736_v35  ;;  %v1754_v34 = vld [vmem:[%s2609_s15] ss:$0 sm:$0xff] }
 0x4c4   :  { %513 = vmatpush.msrb.mxu3 %v1737_v36 }
 0x4c5   :  { %1644 = vmatmul.msk.f32.vlgmr.msrb.gmra.mxu3 %vm148_vm1, %v484_v37 }
 0x4c7   :  { %v1790_v38 = vpop.eup %1789 }
 0x4c8   :  { %v485_v39 = vmul.f32 %v1790_v38, %v1782_v17 }
 0x4cd   :  { %1645 = vmatmul.msk.f32.gmra.mxu3 %vm148_vm1, %v485_v39 }
 0x52e   :  { %v419_v44 = vpop.f32.mrf.mxu0 }
 0x52f   :  { %1648 = vmatmul.msk.f32.vlgmr.msra.gmra.mxu2 %vm148_vm1, %v419_v44 }
 0x53f   :  { %v422_v46 = vpop.f32.mrf.mxu0 }
 0x540   :  { %1649 = vmatmul.msk.f32.gmra.mxu2 %vm148_vm1, %v422_v46  ;;  %v1755_v46 = vld [vmem:[%s2611_s17] ss:$0 sm:$0xff] }
 0x548   :  { %v515_v47 = vpop.f32.mrf.mxu3 }
 0x549   :  { %1646 = vmatmul.msk.f32.vlgmr.msra.gmra.mxu0 %vm148_vm1, %v515_v47 }
 0x550   :  { %v518_v48 = vpop.f32.mrf.mxu3 }
 0x551   :  { %1647 = vmatmul.msk.f32.gmra.mxu0 %vm148_vm1, %v518_v48 }
 0x5b2   :  { %v573_v51 = vpop.f32.mrf.mxu2 }
 0x5c3   :  { %v576_v57 = vpop.f32.mrf.mxu2 }
 0x5c6   :  { %v544_v52 = vpop.f32.mrf.mxu0 }
 0x5c7   :  { %v574_v53 = vadd.f32 %v573_v51, %v544_v52 }
 0x5c9   :  { %v583_v54 = vadd.f32 %v1752_v50, %v574_v53 }
 0x5cb   :  { %v585_v55 = vadd.f32 %v583_v54, %v2193_v18  ;;  %v775_v54 = vld [vmem:[%s2612_s18 + $0x38] sm:$0xff] }
 0x5cc   :  { %795 = vmatpush.msrb.mxu1 %v775_v54 }
 0x5cd   :  { %v589_v56 = vsel %vm218_vm5, %v585_v55, 0.0 }
 0x5ce   :  { %590 = vadd.xlane.f32.xlu0 %v589_v56  ;;  %v547_v58 = vpop.f32.mrf.mxu0 }
 0x5cf   :  { %v577_v59 = vadd.f32 %v576_v57, %v547_v58  ;;  %v774_v58 = vld [vmem:[%s2612_s18 + $0x30] sm:$0xff] }
 0x5d0   :  { %796 = vmatpush.msrb.mxu1 %v774_v58 }
 0x5d1   :  { %v584_v60 = vadd.f32 %v1752_v50, %v577_v59 }
 0x5d3   :  { %v586_v61 = vadd.f32 %v584_v60, %v2197_v26  ;;  %v646_v26 = vld [vmem:[%s2610_s16 + $0x18] sm:$0xff] }
 0x5d4   :  { %669 = vmatpush.msra.mxu3 %v646_v26 }
 0x5d5   :  { %v592_v62 = vsel %vm218_vm5, %v586_v61, 0.0 }
 0x5d6   :  { %593 = vadd.xlane.f32.xlu2 %v592_v62  ;;  %670 = vmatpush.msra.mxu3 %v645_v8  ;;  %v773_v62 = vld [vmem:[%s2612_s18 + $0x28] sm:$0xff]  ;;  %v770_v8 = vld [vmem:[%s2612_s18 + $0x10] sm:$0xff] }
 0x5d7   :  { %797 = vmatpush.msrb.mxu1 %v773_v62 }
 0x5d8   :  { %671 = vmatpush.msra.mxu3 %v644_v9 }
 0x5da   :  { %672 = vmatpush.msra.mxu3 %v643_v10 }
 0x641   :  { %v591_v63 = vpop.xlane.xlu0 %590 }
 0x642   :  { %v595_v0 = vmul.f32 %v591_v63, %v2170_v45 }
 0x644   :  { %v597_v1 = vsub.f32 %v585_v55, %v595_v0 }
 0x646   :  { %v599_v2 = vmul.f32 %v597_v1, %v597_v1 }
 0x648   :  { %v601_v3 = vsel %vm218_vm5, %v599_v2, 0.0  ;;  %v772_v2 = vld [vmem:[%s2612_s18 + $0x20] sm:$0xff] }
 0x649   :  { %602 = vadd.xlane.f32.xlu1 %v601_v3  ;;  %v594_v18 = vpop.xlane.xlu2 %593  ;;  %798 = vmatpush.msrb.mxu1 %v772_v2 }
 0x64a   :  { %v596_v4 = vmul.f32 %v594_v18, %v2170_v45 }
 0x64c   :  { %v598_v5 = vsub.f32 %v586_v61, %v596_v4 }
 0x64e   :  { %v600_v6 = vmul.f32 %v598_v5, %v598_v5 }
 0x650   :  { %v604_v7 = vsel %vm218_vm5, %v600_v6, 0.0 }
 0x651   :  { %605 = vadd.xlane.f32.xlu2 %v604_v7 }
 0x6bc   :  { %v603_v11 = vpop.xlane.xlu1 %602 }
 0x6bd   :  { %v607_v12 = vmul.f32 %v603_v11, %v2170_v45 }
 0x6bf   :  { %v609_v13 = vadd.f32 1e-12, %v607_v12 }
 0x6c1   :  { %1791 = vrsqrt.f32 %v609_v13  ;;  %vm617_vm14 = vweird.f32 %v609_v13 }
 0x6c4   :  { %v606_v14 = vpop.xlane.xlu2 %605 }
 0x6c5   :  { %v608_v15 = vmul.f32 %v606_v14, %v2170_v45 }
 0x6c7   :  { %v1792_v16 = vpop.eup %1791  ;;  %v610_v17 = vadd.f32 1e-12, %v608_v15 }
 0x6c8   :  { %v612_v19 = vmul.f32 %v1792_v16, %v609_v13  ;;  %vm618_vm13 = vweird.f32 %v1792_v16  ;;  %v769_v13 = vld [vmem:[%s2612_s18 + $0x8] sm:$0xff] }
 0x6c9   :  { %1793 = vrsqrt.f32 %v610_v17  ;;  %vm619_vm15 = vmor %vm617_vm14, %vm618_vm13  ;;  %vm627_vm2 = vweird.f32 %v610_v17 }
 0x6ca   :  { %v613_v22 = vmul.f32 %v1792_v16, %v612_v19 }
 0x6cc   :  { %v614_v24 = vmul.f32 0.5, %v613_v22 }
 0x6ce   :  { %v615_v25 = vsub.f32 1.5, %v614_v24 }
 0x6cf   :  { %v1794_v27 = vpop.eup %1793 }
 0x6d0   :  { %v616_v28 = vmul.f32 %v1792_v16, %v615_v25  ;;  %v622_v29 = vmul.f32 %v1794_v27, %v610_v17  ;;  %vm628_vm0 = vweird.f32 %v1794_v27  ;;  %v768_v17 = vld [vmem:[%s2612_s18] sm:$0xff] }
 0x6d1   :  { %vm629_vm3 = vmor %vm627_vm2, %vm628_vm0 }
 0x6d2   :  { %v620_v31 = vsel %vm619_vm15, %v1792_v16, %v616_v28  ;;  %v623_v32 = vmul.f32 %v1794_v27, %v622_v29 }
 0x6d3   :  { %v631_v33 = vmul.f32 %v620_v31, %v597_v1 }
 0x6d4   :  { %v624_v35 = vmul.f32 0.5, %v623_v32 }
 0x6d5   :  { %v636_v36 = vmul.f32 %v1753_v30, %v631_v33 }
 0x6d6   :  { %v625_v37 = vsub.f32 1.5, %v624_v35 }
 0x6d7   :  { %v2296_v38 = vadd.f32 %v1754_v34, %v636_v36 }
 0x6d8   :  { %v626_v39 = vmul.f32 %v1794_v27, %v625_v37 }
 0x6d9   :  { %1650 = vmatmul.msk.f32.vlgmr.msra.gmra.mxu3 %vm218_vm5, %v2296_v38 }
 0x6da   :  { %v630_v40 = vsel %vm629_vm3, %v1794_v27, %v626_v39 }
 0x6db   :  { %v632_v41 = vmul.f32 %v630_v40, %v598_v5  ;;  %v771_v5 = vld [vmem:[%s2612_s18 + $0x18] sm:$0xff] }
 0x6dc   :  { %799 = vmatpush.msrb.mxu1 %v771_v5 }
 0x6dd   :  { %v637_v42 = vmul.f32 %v1753_v30, %v632_v41 }
 0x6de   :  { %800 = vmatpush.msrb.mxu1 %v770_v8 }
 0x6df   :  { %v2300_v44 = vadd.f32 %v1754_v34, %v637_v42 }
 0x6e0   :  { %801 = vmatpush.msrb.mxu1 %v769_v13 }
 0x6e1   :  { %1651 = vmatmul.msk.f32.gmra.mxu3 %vm218_vm5, %v2300_v44 }
 0x6e2   :  { %802 = vmatpush.msrb.mxu1 %v768_v17 }
 0x75c   :  { %v674_v47 = vpop.f32.mrf.mxu3 }
 0x75d   :  { %v2307_v48 = vadd.f32 %v1755_v46, %v674_v47 }
 0x75f   :  { %v2310_v50 = vmul.f32 0.70710677, %v2307_v48  ;;  %v680_v8 = vmul.f32 0.5, %v2307_v48 }
 0x761   :  { %v684_v51 = vmul.f32 %v2310_v50, %v2310_v50 }
 0x763   :  { %v685_v52 = vmin.f32 %v684_v51, 16.0 }
 0x764   :  { %v677_v53 = vpop.f32.mrf.mxu3 }
 0x765   :  { %v686_v55 = vmul.f32 2.1237322e-06, %v685_v52  ;;  %v697_v56 = vmul.f32 3.8918573e-05, %v685_v52  ;;  %v2317_v57 = vadd.f32 %v1755_v46, %v677_v53 }
 0x767   :  { %v687_v59 = vadd.f32 0.00028619796, %v686_v55  ;;  %v698_v60 = vadd.f32 0.001143296, %v697_v56  ;;  %v2323_v61 = vmul.f32 0.70710677, %v2317_v57 }
 0x769   :  { %v688_v63 = vmul.f32 %v687_v59, %v685_v52  ;;  %v699_v0 = vmul.f32 %v698_v60, %v685_v52  ;;  %v724_v1 = vmul.f32 %v2323_v61, %v2323_v61 }
 0x76b   :  { %v700_v3 = vadd.f32 0.014752088, %v699_v0  ;;  %v689_v18 = vadd.f32 0.0036580483, %v688_v63  ;;  %v725_v4 = vmin.f32 %v724_v1, 16.0 }
 0x76d   :  { %v701_v6 = vmul.f32 %v700_v3, %v685_v52  ;;  %v726_v7 = vmul.f32 2.1237322e-06, %v725_v4  ;;  %v737_v26 = vmul.f32 3.8918573e-05, %v725_v4  ;;  %v690_v10 = vmul.f32 %v689_v18, %v685_v52 }
 0x76f   :  { %v702_v9 = vadd.f32 0.112945676, %v701_v6  ;;  %v727_v11 = vadd.f32 0.00028619796, %v726_v7  ;;  %v738_v12 = vadd.f32 0.001143296, %v737_v26 }
 0x770   :  { %v691_v22 = vadd.f32 0.05243302, %v690_v10 }
 0x771   :  { %v703_v14 = vmul.f32 %v702_v9, %v685_v52  ;;  %v728_v15 = vmul.f32 %v727_v11, %v725_v4  ;;  %v739_v16 = vmul.f32 %v738_v12, %v725_v4 }
 0x772   :  { %v692_v30 = vmul.f32 %v691_v22, %v685_v52 }
 0x773   :  { %v704_v19 = vadd.f32 0.4994258, %v703_v14  ;;  %v740_v24 = vadd.f32 0.014752088, %v739_v16  ;;  %v729_v27 = vadd.f32 0.0036580483, %v728_v15 }
 0x774   :  { %v693_v34 = vadd.f32 0.18741608, %v692_v30  ;;  %v681_v16 = vmul.f32 0.5, %v2317_v57 }
 0x775   :  { %v705_v25 = vmul.f32 %v704_v19, %v685_v52  ;;  %v741_v28 = vmul.f32 %v740_v24, %v725_v4  ;;  %v730_v32 = vmul.f32 %v729_v27, %v725_v4  ;;  %v1756_v19 = vld [vmem:[%s2613_s19] ss:$0 sm:$0xff] }
 0x776   :  { %v694_v40 = vmul.f32 %v693_v34, %v685_v52 }
 0x777   :  { %v706_v29 = vadd.f32 1.0, %v705_v25  ;;  %v742_v31 = vadd.f32 0.112945676, %v741_v28  ;;  %v731_v36 = vadd.f32 0.05243302, %v730_v32 }
 0x778   :  { %v695_v53 = vadd.f32 1.1283791, %v694_v40  ;;  %v1658_v40 = vld [vmem:[%s2647_s6 + $0x30] sm:$0xff] }
 0x779   :  { %1795 = vrcp.f32 %v706_v29  ;;  %v743_v33 = vmul.f32 %v742_v31, %v725_v4  ;;  %v732_v46 = vmul.f32 %v731_v36, %v725_v4  ;;  %v718_v51 = vand.u32 2147483648, %v706_v29 }
 0x77a   :  { %v716_v55 = vand.u32 2147483647, %v706_v29  ;;  %vm712_vm6 = vweird.f32 %v706_v29  ;;  %v696_v62 = vmul.f32 %v695_v53, %v2310_v50 }
 0x77b   :  { %v744_v35 = vadd.f32 0.4994258, %v743_v33  ;;  %v733_v56 = vadd.f32 0.18741608, %v732_v46  ;;  %v719_v59 = vor.u32 1.1754944e-38, %v718_v51 }
 0x77c   :  { %vm717_vm8 = vcmp.eq.f32.partialorder %v716_v55, 8.507059e+37 }
 0x77d   :  { %v745_v37 = vmul.f32 %v744_v35, %v725_v4  ;;  %v734_v0 = vmul.f32 %v733_v56, %v725_v4 }
 0x77f   :  { %v1796_v39 = vpop.eup %1795  ;;  %v746_v42 = vadd.f32 1.0, %v745_v37  ;;  %v735_v6 = vadd.f32 1.1283791, %v734_v0  ;;  %v1757_v0 = vld [vmem:[%s2614_s20] ss:$0 sm:$0xff] }
 0x780   :  { %v708_v41 = vmul.f32 %v1796_v39, %v706_v29  ;;  %vm713_vm4 = vweird.f32 %v1796_v39 }
 0x781   :  { %1797 = vrcp.f32 %v746_v42  ;;  %vm714_vm7 = vmor %vm712_vm6, %vm713_vm4  ;;  %v758_v5 = vand.u32 2147483648, %v746_v42  ;;  %v756_v26 = vand.u32 2147483647, %v746_v42  ;;  %vm752_vm10 = vweird.f32 %v746_v42 }
 0x782   :  { %v709_v47 = vsub.f32 1.0, %v708_v41  ;;  %v736_v4 = vmul.f32 %v735_v6, %v2323_v61  ;;  %v1657_v41 = vld [vmem:[%s2647_s6 + $0x28] sm:$0xff] }
 0x783   :  { %v759_v11 = vor.u32 1.1754944e-38, %v758_v5  ;;  %vm757_vm13 = vcmp.eq.f32.partialorder %v756_v26, 8.507059e+37  ;;  %v1758_v5 = vld [vmem:[%s2615_s21] ss:$0 sm:$0xff] }
 0x784   :  { %v710_v54 = vmul.f32 %v1796_v39, %v709_v47 }
 0x786   :  { %v711_v58 = vadd.f32 %v1796_v39, %v710_v54 }
 0x787   :  { %v1798_v60 = vpop.eup %1797 }
 0x788   :  { %v715_v63 = vsel %vm714_vm7, %v1796_v39, %v711_v58  ;;  %v748_v1 = vmul.f32 %v1798_v60, %v746_v42  ;;  %vm753_vm9 = vweird.f32 %v1798_v60  ;;  %v1656_v42 = vld [vmem:[%s2647_s6 + $0x20] sm:$0xff] }
 0x789   :  { %v720_v52 = vsel %vm717_vm8, %v719_v59, %v715_v63  ;;  %vm754_vm12 = vmor %vm752_vm10, %vm753_vm9 }
 0x78a   :  { %v721_v2 = vmul.f32 %v720_v52, %v696_v62  ;;  %v749_v3 = vsub.f32 1.0, %v748_v1 }
 0x78c   :  { %v1652_v18 = vclamps-f32 %v721_v2, 1.0  ;;  %v750_v7 = vmul.f32 %v1798_v60, %v749_v3 }
 0x78e   :  { %v764_v9 = vadd.f32 1.0, %v1652_v18  ;;  %v751_v10 = vadd.f32 %v1798_v60, %v750_v7 }
 0x790   :  { %v766_v50 = vmul.f32 %v764_v9, %v680_v8  ;;  %v755_v12 = vsel %vm754_vm12, %v1798_v60, %v751_v10 }
 0x791   :  { %v760_v13 = vsel %vm757_vm13, %v759_v11, %v755_v12  ;;  %v1759_v12 = vld [vmem:[%s2649_s3 + $0x1] ss:$0 sm:$0xff]  ;;  %s1952_s3 = smov [#allocation8]  }
 0x792   :  { %1654 = vmatmul.msk.f32.vlgmr.msrb.gmra.mxu1 %vm780_vm11, %v766_v50  ;;  %v761_v14 = vmul.f32 %v760_v13, %v736_v4 }
 0x794   :  { %v1653_v15 = vclamps-f32 %v761_v14, 1.0 }
 0x796   :  { %v765_v17 = vadd.f32 1.0, %v1653_v15 }
 0x798   :  { %v767_v48 = vmul.f32 %v765_v17, %v681_v16 }
 0x79a   :  { %1655 = vmatmul.msk.f32.gmra.mxu1 %vm780_vm11, %v767_v48 }
 0x80f   :  { %v804_v22 = vpop.f32.mrf.mxu1 }
 0x810   :  { %v805_v24 = vadd.f32 %v1756_v19, %v804_v22 }
 0x812   :  { %v810_v61 = vadd.f32 %v805_v24, %v2296_v38 }
 0x814   :  { %v814_v25 = vsel %vm218_vm5, %v810_v61, 0.0 }
 0x815   :  { %815 = vadd.xlane.f32.xlu2 %v814_v25 }
 0x817   :  { %v807_v27 = vpop.f32.mrf.mxu1 }
 0x818   :  { %v808_v28 = vadd.f32 %v1756_v19, %v807_v27 }
 0x81a   :  { %v811_v29 = vadd.f32 %v808_v28, %v2300_v44  ;;  %v1659_v44 = vld [vmem:[%s2647_s6 + $0x38] sm:$0xff] }
 0x81b   :  { %896 = vmatpush.msrb.mxu0 %v1659_v44 }
 0x81c   :  { %v817_v57 = vsel %vm218_vm5, %v811_v29, 0.0 }
 0x81d   :  { %818 = vadd.xlane.f32.xlu2 %v817_v57  ;;  %897 = vmatpush.msrb.mxu0 %v1658_v40 }
 0x81f   :  { %898 = vmatpush.msrb.mxu0 %v1657_v41 }
 0x821   :  { %899 = vmatpush.msrb.mxu0 %v1656_v42 }
 0x888   :  { %v816_v30 = vpop.xlane.xlu2 %815 }
 0x889   :  { %v820_v31 = vmul.f32 %v816_v30, %v2170_v45 }
 0x88b   :  { %v822_v32 = vsub.f32 %v810_v61, %v820_v31 }
 0x88d   :  { %v824_v33 = vmul.f32 %v822_v32, %v822_v32 }
 0x88f   :  { %v826_v34 = vsel %vm218_vm5, %v824_v33, 0.0 }
 0x890   :  { %827 = vadd.xlane.f32.xlu2 %v826_v34  ;;  %v819_v35 = vpop.xlane.xlu2 %818 }
 0x891   :  { %v821_v38 = vmul.f32 %v819_v35, %v2170_v45 }
 0x893   :  { %v823_v36 = vsub.f32 %v811_v29, %v821_v38 }
 0x895   :  { %v825_v37 = vmul.f32 %v823_v36, %v823_v36 }
 0x897   :  { %v829_v39 = vsel %vm218_vm5, %v825_v37, 0.0 }
 0x898   :  { %830 = vadd.xlane.f32.xlu0 %v829_v39 }
 0x903   :  { %v828_v46 = vpop.xlane.xlu2 %827 }
 0x904   :  { %v832_v47 = vmul.f32 %v828_v46, %v2170_v45 }
 0x906   :  { %v834_v51 = vadd.f32 1e-12, %v832_v47 }
 0x908   :  { %1799 = vrsqrt.f32 %v834_v51  ;;  %vm842_vm15 = vweird.f32 %v834_v51 }
 0x90b   :  { %v831_v53 = vpop.xlane.xlu0 %830 }
 0x90c   :  { %v833_v54 = vmul.f32 %v831_v53, %v2170_v45 }
 0x90e   :  { %v1800_v55 = vpop.eup %1799  ;;  %v835_v58 = vadd.f32 1e-12, %v833_v54 }
 0x90f   :  { %v837_v56 = vmul.f32 %v1800_v55, %v834_v51  ;;  %vm843_vm14 = vweird.f32 %v1800_v55 }
 0x910   :  { %1801 = vrsqrt.f32 %v835_v58  ;;  %vm844_vm0 = vmor %vm842_vm15, %vm843_vm14  ;;  %vm852_vm3 = vweird.f32 %v835_v58 }
 0x911   :  { %v838_v59 = vmul.f32 %v1800_v55, %v837_v56 }
 0x913   :  { %v839_v60 = vmul.f32 0.5, %v838_v59 }
 0x915   :  { %v840_v62 = vsub.f32 1.5, %v839_v60 }
 0x916   :  { %v1802_v63 = vpop.eup %1801 }
 0x917   :  { %v841_v52 = vmul.f32 %v1800_v55, %v840_v62  ;;  %v847_v1 = vmul.f32 %v1802_v63, %v835_v58  ;;  %vm853_vm2 = vweird.f32 %v1802_v63 }
 0x918   :  { %vm854_vm4 = vmor %vm852_vm3, %vm853_vm2 }
 0x919   :  { %v845_v2 = vsel %vm844_vm0, %v1800_v55, %v841_v52  ;;  %v848_v18 = vmul.f32 %v1802_v63, %v847_v1 }
 0x91a   :  { %v856_v3 = vmul.f32 %v845_v2, %v822_v32 }
 0x91b   :  { %v849_v7 = vmul.f32 0.5, %v848_v18 }
 0x91c   :  { %v861_v6 = vmul.f32 %v1757_v0, %v856_v3 }
 0x91d   :  { %v850_v26 = vsub.f32 1.5, %v849_v7 }
 0x91e   :  { %v2382_v8 = vadd.f32 %v1758_v5, %v861_v6  ;;  %v1664_v6 = vld [vmem:[%s2606_s12 + $0x28] sm:$0xff] }
 0x91f   :  { %v851_v9 = vmul.f32 %v1802_v63, %v850_v26 }
 0x920   :  { %1661 = vmatmul.msk.f32.vlgmr.msrb.gmra.mxu0 %vm218_vm5, %v2382_v8 }
 0x921   :  { %v855_v10 = vsel %vm854_vm4, %v1802_v63, %v851_v9 }
 0x922   :  { %v857_v50 = vmul.f32 %v855_v10, %v823_v36 }
 0x924   :  { %v862_v11 = vmul.f32 %v1757_v0, %v857_v50 }
 0x926   :  { %v2386_v4 = vadd.f32 %v1758_v5, %v862_v11 }
 0x928   :  { %1662 = vmatmul.msk.f32.gmra.mxu0 %vm218_vm5, %v2386_v4 }
 0x99d   :  { %v901_v13 = vpop.f32.mrf.mxu0 }
 0x99e   :  { %v902_v14 = vadd.f32 %v1759_v12, %v901_v13 }
 0x9a0   :  { %914 = vrot.lane.b32.xlu1 %v902_v14, %s1946_s10 }
 0x9a5   :  { %v904_v15 = vpop.f32.mrf.mxu0 }
 0x9a6   :  { %v905_v16 = vadd.f32 %v1759_v12, %v904_v15 }
 0x9a8   :  { %1012 = vrot.lane.b32.xlu0 %v905_v16, %s1947_s29  ;;  %916 = vrot.lane.b32.xlu2 %v905_v16, %s1946_s10  ;;  %v1738_v36 = vpack.i.bf16 %v902_v14, %v905_v16  ;;  %s1607_s10 = sshll.u32 %s1952_s3, 4  ;;  %s1608_s10 = int_to_ptr.vmem [resolvable:$true] %s1607_s10 }
 0x9a9   :  { %1008 = vrot.lane.b32.xlu1 %v905_v16, %s1948_s1 }
 0x9b0   :  { %1006 = vrot.lane.b32.xlu0 %v902_v14, %s1948_s1  ;;  %1010 = vrot.lane.b32.xlu2 %v902_v14, %s1947_s29 }
 0xa02   :  { %v917_v17 = vpop.permute.xlu2 %916 }
 0xa03   :  { %1667 = vmatpush.xpose.msk.msrb.mxu2 %vm148_vm1, %v917_v17  ;;  %v1663_v17 = vld [vmem:[%s2606_s12 + $0x20] sm:$0xff] }
 0xa0a   :  { %v1011_v22 = vpop.permute.xlu2 %1010 }
 0xa12   :  { %v915_v48 = vpop.permute.xlu1 %914 }
 0xa13   :  { %1668 = vmatpush.xpose.msk.msrb.mxu2 %vm148_vm1, %v915_v48  ;;  %v1666_v48 = vld [vmem:[%s2606_s12 + $0x38] sm:$0xff] }
 0xa16   :  { %1669 = vmatmul.msk.f32.vlgmr.msrb.gmra.mxu2 %vm148_vm1, %v902_v14 }
 0xa17   :  { %1122 = vmatpush.msra.mxu2 %v1666_v48 }
 0xa1a   :  { %v1013_v19 = vpop.permute.xlu0 %1012 }
 0xa1b   :  { %1673 = vmatpush.xpose.msk.msra.mxu1 %vm148_vm1, %v1013_v19  ;;  %v1009_v61 = vpop.permute.xlu1 %1008  ;;  %v1665_v19 = vld [vmem:[%s2606_s12 + $0x30] sm:$0xff] }
 0xa1c   :  { %1123 = vmatpush.msra.mxu2 %v1665_v19  ;;  %v1763_v19 = vld [vmem:[%s2611_s17 + $0x1] ss:$0 sm:$0xff] }
 0xa1e   :  { %1670 = vmatmul.msk.f32.gmra.mxu2 %vm148_vm1, %v905_v16 }
 0xa1f   :  { %1674 = vmatpush.xpose.msk.msra.mxu1 %vm148_vm1, %v1011_v22 }
 0xa22   :  { %v1007_v24 = vpop.permute.xlu0 %1006 }
 0xa23   :  { %1675 = vmatmul.msk.f32.vlgmr.msra.gmra.mxu1 %vm148_vm1, %v1007_v24 }
 0xa2b   :  { %1676 = vmatmul.msk.f32.gmra.mxu1 %vm148_vm1, %v1009_v61 }
 0xa99   :  { %v943_v25 = vpop.f32.mrf.mxu2 }
 0xa9a   :  { %v944_v27 = vadd.f32 %v943_v25, %v2224_v43 }
 0xa9c   :  { %v949_v28 = vsel %vm148_vm1, %v944_v27, -inf }
 0xa9d   :  { %950 = vmax.xlane.f32.xlu2 %v949_v28  ;;  %v1760_v28 = vld [vmem:[%s2607_s13 + $0x1] ss:$0 sm:$0xff] }
 0xaa0   :  { %v1039_v29 = vpop.f32.mrf.mxu1 }
 0xaa1   :  { %v946_v57 = vpop.f32.mrf.mxu2  ;;  %v1040_v30 = vadd.f32 %v1039_v29, %v2224_v43 }
 0xaa2   :  { %v947_v31 = vadd.f32 %v946_v57, %v2231_v49 }
 0xaa3   :  { %v1045_v32 = vsel %vm148_vm1, %v1040_v30, -inf }
 0xaa4   :  { %v952_v33 = vsel %vm148_vm1, %v947_v31, -inf  ;;  %1046 = vmax.xlane.f32.xlu0 %v1045_v32 }
 0xaa5   :  { %953 = vmax.xlane.f32.xlu1 %v952_v33 }
 0xaa8   :  { %v1042_v34 = vpop.f32.mrf.mxu1 }
 0xaa9   :  { %v1043_v35 = vadd.f32 %v1042_v34, %v2231_v49 }
 0xaab   :  { %v1048_v38 = vsel %vm148_vm1, %v1043_v35, -inf }
 0xaac   :  { %1049 = vmax.xlane.f32.xlu2 %v1048_v38 }
 0xac4   :  { %1739 = vrot.lane.b32.xlu2 %v1738_v36, %s1949_s28 }
 0xb10   :  { %v951_v37 = vpop.xlane.xlu2 %950 }
 0xb11   :  { %v955_v39 = vsub.f32 %v944_v27, %v951_v37 }
 0xb13   :  { %v957_v43 = vmul.f32 1.442695, %v955_v39 }
 0xb15   :  { %1803 = vpow2.f32 %v957_v43 }
 0xb17   :  { %v1047_v44 = vpop.xlane.xlu0 %1046 }
 0xb18   :  { %v954_v40 = vpop.xlane.xlu1 %953  ;;  %v1051_v41 = vsub.f32 %v1040_v30, %v1047_v44 }
 0xb19   :  { %v956_v42 = vsub.f32 %v947_v31, %v954_v40 }
 0xb1a   :  { %v1053_v47 = vmul.f32 1.442695, %v1051_v41 }
 0xb1b   :  { %v1804_v46 = vpop.eup %1803  ;;  %v959_v51 = vmul.f32 1.442695, %v956_v42 }
 0xb1c   :  { %v961_v53 = vsel %vm148_vm1, %v1804_v46, 0.0  ;;  %1805 = vpow2.f32 %v1053_v47 }
 0xb1d   :  { %962 = vadd.xlane.f32.xlu0 %v961_v53  ;;  %1807 = vpow2.f32 %v959_v51  ;;  %v1688_v53 = vld [vmem:[%s2610_s16 + $0x30] sm:$0xff] }
 0xb1f   :  { %v1050_v49 = vpop.xlane.xlu2 %1049 }
 0xb20   :  { %v1052_v54 = vsub.f32 %v1043_v35, %v1050_v49  ;;  %v1687_v49 = vld [vmem:[%s2610_s16 + $0x28] sm:$0xff] }
 0xb22   :  { %v1806_v55 = vpop.eup %1805  ;;  %v1055_v56 = vmul.f32 1.442695, %v1052_v54  ;;  %v1686_v54 = vld [vmem:[%s2610_s16 + $0x20] sm:$0xff] }
 0xb23   :  { %v1808_v58 = vpop.eup %1807  ;;  %v1057_v59 = vsel %vm148_vm1, %v1806_v55, 0.0 }
 0xb24   :  { %1809 = vpow2.f32 %v1055_v56  ;;  %1058 = vadd.xlane.f32.xlu1 %v1057_v59  ;;  %v964_v60 = vsel %vm148_vm1, %v1808_v58, 0.0 }
 0xb25   :  { %965 = vadd.xlane.f32.xlu0 %v964_v60 }
 0xb27   :  { %v1740_v62 = vpop.permute.xlu2 %1739 }
 0xb28   :  { %v1741_v63 = vunpack.i.l.bf16 %v1740_v62  ;;  %v1742_v0 = vunpack.i.h.bf16 %v1740_v62 }
 0xb2a   :  { %v1810_v52 = vpop.eup %1809  ;;  %997 = vmatpush.msrb.mxu3 %v1741_v63 }
 0xb2b   :  { %v1060_v1 = vsel %vm148_vm1, %v1810_v52, 0.0 }
 0xb2c   :  { %998 = vmatpush.msrb.mxu3 %v1742_v0 }
 0xb2d   :  { %1061 = vadd.xlane.f32.xlu0 %v1060_v1 }
 0xb2e   :  { %1151 = vmatpush.msra.mxu3 %v1664_v6  ;;  %v1761_v6 = vld [vmem:[%s2608_s14 + $0x1] ss:$0 sm:$0xff] }
 0xb30   :  { %1152 = vmatpush.msra.mxu3 %v1663_v17 }
 0xb3d   :  { %1744 = vrot.lane.b32.xlu1 %v1738_v36, %s1950_s0 }
 0xb90   :  { %v963_v2 = vpop.xlane.xlu0 %962 }
 0xb91   :  { %1811 = vrcp.f32 %v963_v2 }
 0xb97   :  { %v1812_v3 = vpop.eup %1811  ;;  %v1059_v9 = vpop.xlane.xlu1 %1058 }
 0xb98   :  { %v969_v18 = vmul.f32 %v1812_v3, %v1804_v46  ;;  %v966_v5 = vpop.xlane.xlu0 %965 }
 0xb99   :  { %1813 = vrcp.f32 %v966_v5 }
 0xb9a   :  { %1671 = vmatmul.msk.f32.vlgmr.msrb.gmra.mxu3 %vm148_vm1, %v969_v18  ;;  %1815 = vrcp.f32 %v1059_v9 }
 0xb9f   :  { %v1814_v7 = vpop.eup %1813 }
 0xba0   :  { %v970_v26 = vmul.f32 %v1814_v7, %v1808_v58  ;;  %v1062_v10 = vpop.xlane.xlu0 %1061  ;;  %v1816_v11 = vpop.eup %1815 }
 0xba1   :  { %1817 = vrcp.f32 %v1062_v10  ;;  %v1065_v14 = vmul.f32 %v1816_v11, %v1806_v55  ;;  %v1762_v10 = vld [vmem:[%s2609_s15 + $0x1] ss:$0 sm:$0xff]  ;;  %s1609_s15 = sshll.u32 %s2621_s27, 4  ;;  %s1610_s15 = int_to_ptr.hbm [resolvable:$true] %s1609_s15 }
 0xba2   :  { %1672 = vmatmul.msk.f32.gmra.mxu3 %vm148_vm1, %v970_v26 }
 0xba7   :  { %v1818_v15 = vpop.eup %1817 }
 0xba8   :  { %v1066_v16 = vmul.f32 %v1818_v15, %v1810_v52 }
 0xbaf   :  { %v1745_v50 = vpop.permute.xlu1 %1744 }
 0xbb0   :  { %v1746_v12 = vunpack.i.l.bf16 %v1745_v50  ;;  %v1747_v13 = vunpack.i.h.bf16 %v1745_v50 }
 0xbb2   :  { %1093 = vmatpush.msra.mxu0 %v1746_v12 }
 0xbb4   :  { %1094 = vmatpush.msra.mxu0 %v1747_v13 }
 0xbb5   :  { %1677 = vmatmul.msk.f32.vlgmr.msra.gmra.mxu0 %vm148_vm1, %v1065_v14 }
 0xbbd   :  { %1678 = vmatmul.msk.f32.gmra.mxu0 %vm148_vm1, %v1066_v16 }
 0xc1d   :  { %v1000_v22 = vpop.f32.mrf.mxu3 }
 0xc1e   :  { %1681 = vmatmul.msk.f32.vlgmr.msra.gmra.mxu3 %vm148_vm1, %v1000_v22 }
 0xc25   :  { %v1003_v24 = vpop.f32.mrf.mxu3 }
 0xc26   :  { %1682 = vmatmul.msk.f32.gmra.mxu3 %vm148_vm1, %v1003_v24 }
 0xc32   :  { %v1096_v61 = vpop.f32.mrf.mxu0 }
 0xc33   :  { %1679 = vmatmul.msk.f32.vlgmr.msra.gmra.mxu2 %vm148_vm1, %v1096_v61 }
 0xc3a   :  { %v1099_v25 = vpop.f32.mrf.mxu0 }
 0xc3b   :  { %1680 = vmatmul.msk.f32.gmra.mxu2 %vm148_vm1, %v1099_v25 }
 0xca1   :  { %v1154_v27 = vpop.f32.mrf.mxu3 }
 0xca9   :  { %v1157_v33 = vpop.f32.mrf.mxu3 }
 0xcb6   :  { %v1125_v29 = vpop.f32.mrf.mxu2 }
 0xcb7   :  { %v1155_v57 = vadd.f32 %v1154_v27, %v1125_v29  ;;  %v1702_v29 = vld [vmem:[%s2612_s18 + $0x78] sm:$0xff] }
 0xcb8   :  { %1382 = vmatpush.msrb.mxu0 %v1702_v29 }
 0xcb9   :  { %v1165_v30 = vadd.f32 %v1760_v28, %v1155_v57 }
 0xcbb   :  { %v1167_v31 = vadd.f32 %v1165_v30, %v2382_v8 }
 0xcbd   :  { %v1173_v32 = vsel %vm218_vm5, %v1167_v31, 0.0 }
 0xcbe   :  { %1174 = vadd.xlane.f32.xlu0 %v1173_v32  ;;  %v1128_v34 = vpop.f32.mrf.mxu2  ;;  %v1701_v32 = vld [vmem:[%s2612_s18 + $0x70] sm:$0xff] }
 0xcbf   :  { %v1158_v35 = vadd.f32 %v1157_v33, %v1128_v34  ;;  %1383 = vmatpush.msrb.mxu0 %v1701_v32 }
 0xcc1   :  { %v1166_v38 = vadd.f32 %v1760_v28, %v1158_v35 }
 0xcc3   :  { %v1168_v36 = vadd.f32 %v1166_v38, %v2386_v4  ;;  %v1689_v4 = vld [vmem:[%s2610_s16 + $0x38] sm:$0xff]  ;;  %v1700_v38 = vld [vmem:[%s2612_s18 + $0x68] sm:$0xff]  ;;  %s1951_s16 = smov [#allocation7]  }
 0xcc4   :  { %1255 = vmatpush.msrb.mxu1 %v1689_v4  ;;  %1384 = vmatpush.msrb.mxu0 %v1700_v38 }
 0xcc5   :  { %v1176_v37 = vsel %vm218_vm5, %v1168_v36, 0.0 }
 0xcc6   :  { %1177 = vadd.xlane.f32.xlu2 %v1176_v37  ;;  %1256 = vmatpush.msrb.mxu1 %v1688_v53 }
 0xcc8   :  { %1257 = vmatpush.msrb.mxu1 %v1687_v49 }
 0xcca   :  { %1258 = vmatpush.msrb.mxu1 %v1686_v54 }
 0xd31   :  { %v1175_v39 = vpop.xlane.xlu0 %1174 }
 0xd32   :  { %v1179_v43 = vmul.f32 %v1175_v39, %v2170_v45 }
 0xd34   :  { %v1181_v44 = vsub.f32 %v1167_v31, %v1179_v43  ;;  %v1699_v43 = vld [vmem:[%s2612_s18 + $0x60] sm:$0xff] }
 0xd35   :  { %1385 = vmatpush.msrb.mxu0 %v1699_v43 }
 0xd36   :  { %v1183_v40 = vmul.f32 %v1181_v44, %v1181_v44 }
 0xd38   :  { %v1185_v41 = vsel %vm218_vm5, %v1183_v40, 0.0 }
 0xd39   :  { %1186 = vadd.xlane.f32.xlu0 %v1185_v41  ;;  %v1178_v8 = vpop.xlane.xlu2 %1177 }
 0xd3a   :  { %v1180_v42 = vmul.f32 %v1178_v8, %v2170_v45  ;;  %v1698_v8 = vld [vmem:[%s2612_s18 + $0x58] sm:$0xff] }
 0xd3b   :  { %1386 = vmatpush.msrb.mxu0 %v1698_v8 }
 0xd3c   :  { %v1182_v46 = vsub.f32 %v1168_v36, %v1180_v42 }
 0xd3e   :  { %v1184_v47 = vmul.f32 %v1182_v46, %v1182_v46 }
 0xd40   :  { %v1188_v51 = vsel %vm218_vm5, %v1184_v47, 0.0 }
 0xd41   :  { %1189 = vadd.xlane.f32.xlu1 %v1188_v51  ;;  %v1697_v51 = vld [vmem:[%s2612_s18 + $0x50] sm:$0xff] }
 0xd42   :  { %1387 = vmatpush.msrb.mxu0 %v1697_v51 }
 0xdac   :  { %v1187_v55 = vpop.xlane.xlu0 %1186 }
 0xdad   :  { %v1191_v56 = vmul.f32 %v1187_v55, %v2170_v45  ;;  %v1696_v55 = vld [vmem:[%s2612_s18 + $0x48] sm:$0xff] }
 0xdae   :  { %1388 = vmatpush.msrb.mxu0 %v1696_v55 }
 0xdaf   :  { %v1193_v58 = vadd.f32 1e-12, %v1191_v56 }
 0xdb1   :  { %1819 = vrsqrt.f32 %v1193_v58  ;;  %vm1201_vm7 = vweird.f32 %v1193_v58 }
 0xdb4   :  { %v1190_v59 = vpop.xlane.xlu1 %1189 }
 0xdb5   :  { %v1192_v60 = vmul.f32 %v1190_v59, %v2170_v45 }
 0xdb7   :  { %v1820_v62 = vpop.eup %1819  ;;  %v1194_v63 = vadd.f32 1e-12, %v1192_v60  ;;  %v1695_v60 = vld [vmem:[%s2612_s18 + $0x40] sm:$0xff]  ;;  %s1598_s18 = sshll.u32 %s2620_s26, 4  ;;  %s1599_s18 = int_to_ptr.hbm [resolvable:$true] %s1598_s18 }
 0xdb8   :  { %v1196_v52 = vmul.f32 %v1820_v62, %v1193_v58  ;;  %vm1202_vm6 = vweird.f32 %v1820_v62  ;;  %1389 = vmatpush.msrb.mxu0 %v1695_v60  ;;  %v1764_v60 = vld [vmem:[%s2613_s19 + $0x1] ss:$0 sm:$0xff]  ;;  %s1596_s19 = sshll.u32 %s1951_s16, 4  ;;  %s1597_s19 = int_to_ptr.vmem [resolvable:$true] %s1596_s19 }
 0xdb9   :  { %1821 = vrsqrt.f32 %v1194_v63  ;;  %vm1203_vm8 = vmor %vm1201_vm7, %vm1202_vm6  ;;  %vm1211_vm10 = vweird.f32 %v1194_v63 }
 0xdba   :  { %v1197_v0 = vmul.f32 %v1820_v62, %v1196_v52 }
 0xdbc   :  { %v1198_v1 = vmul.f32 0.5, %v1197_v0 }
 0xdbe   :  { %v1199_v2 = vsub.f32 1.5, %v1198_v1 }
 0xdbf   :  { %v1822_v3 = vpop.eup %1821 }
 0xdc0   :  { %v1200_v18 = vmul.f32 %v1820_v62, %v1199_v2  ;;  %v1206_v5 = vmul.f32 %v1822_v3, %v1194_v63  ;;  %vm1212_vm9 = vweird.f32 %v1822_v3 }
 0xdc1   :  { %vm1213_vm12 = vmor %vm1211_vm10, %vm1212_vm9 }
 0xdc2   :  { %v1204_v7 = vsel %vm1203_vm8, %v1820_v62, %v1200_v18  ;;  %v1207_v26 = vmul.f32 %v1822_v3, %v1206_v5 }
 0xdc3   :  { %v1215_v9 = vmul.f32 %v1204_v7, %v1181_v44 }
 0xdc4   :  { %v1208_v50 = vmul.f32 0.5, %v1207_v26 }
 0xdc5   :  { %v1220_v11 = vmul.f32 %v1761_v6, %v1215_v9 }
 0xdc6   :  { %v1209_v12 = vsub.f32 1.5, %v1208_v50 }
 0xdc7   :  { %v2472_v13 = vadd.f32 %v1762_v10, %v1220_v11 }
 0xdc8   :  { %v1210_v14 = vmul.f32 %v1822_v3, %v1209_v12 }
 0xdc9   :  { %1691 = vmatmul.msk.f32.vlgmr.msrb.gmra.mxu1 %vm218_vm5, %v2472_v13 }
 0xdca   :  { %v1214_v15 = vsel %vm1213_vm12, %v1822_v3, %v1210_v14 }
 0xdcb   :  { %v1216_v16 = vmul.f32 %v1214_v15, %v1182_v46 }
 0xdcd   :  { %v1221_v17 = vmul.f32 %v1761_v6, %v1216_v16 }
 0xdcf   :  { %v2476_v48 = vadd.f32 %v1762_v10, %v1221_v17 }
 0xdd1   :  { %1692 = vmatmul.msk.f32.gmra.mxu1 %vm218_vm5, %v2476_v48 }
 0xe46   :  { %v1260_v22 = vpop.f32.mrf.mxu1 }
 0xe47   :  { %v2483_v24 = vadd.f32 %v1763_v19, %v1260_v22 }
 0xe49   :  { %v2486_v61 = vmul.f32 0.70710677, %v2483_v24 }
 0xe4b   :  { %v1270_v25 = vmul.f32 %v2486_v61, %v2486_v61 }
 0xe4d   :  { %v1271_v27 = vmin.f32 %v1270_v25, 16.0 }
 0xe4e   :  { %v1263_v28 = vpop.f32.mrf.mxu1 }
 0xe4f   :  { %v1272_v57 = vmul.f32 2.1237322e-06, %v1271_v27  ;;  %v1283_v30 = vmul.f32 3.8918573e-05, %v1271_v27  ;;  %v2493_v31 = vadd.f32 %v1763_v19, %v1263_v28 }
 0xe51   :  { %v1273_v33 = vadd.f32 0.00028619796, %v1272_v57  ;;  %v1284_v34 = vadd.f32 0.001143296, %v1283_v30  ;;  %v2499_v35 = vmul.f32 0.70710677, %v2493_v31 }
 0xe53   :  { %v1274_v36 = vmul.f32 %v1273_v33, %v1271_v27  ;;  %v1285_v37 = vmul.f32 %v1284_v34, %v1271_v27  ;;  %v1310_v39 = vmul.f32 %v2499_v35, %v2499_v35 }
 0xe55   :  { %v1286_v44 = vadd.f32 0.014752088, %v1285_v37  ;;  %v1275_v40 = vadd.f32 0.0036580483, %v1274_v36  ;;  %v1311_v41 = vmin.f32 %v1310_v39, 16.0 }
 0xe57   :  { %v1287_v42 = vmul.f32 %v1286_v44, %v1271_v27  ;;  %v1312_v46 = vmul.f32 2.1237322e-06, %v1311_v41  ;;  %v1323_v47 = vmul.f32 3.8918573e-05, %v1311_v41  ;;  %v1276_v53 = vmul.f32 %v1275_v40, %v1271_v27 }
 0xe59   :  { %v1288_v4 = vadd.f32 0.112945676, %v1287_v42  ;;  %v1313_v49 = vadd.f32 0.00028619796, %v1312_v46  ;;  %v1324_v54 = vadd.f32 0.001143296, %v1323_v47 }
 0xe5a   :  { %v1277_v63 = vadd.f32 0.05243302, %v1276_v53  ;;  %v1266_v46 = vmul.f32 0.5, %v2483_v24 }
 0xe5b   :  { %v1289_v56 = vmul.f32 %v1288_v4, %v1271_v27  ;;  %v1314_v58 = vmul.f32 %v1313_v49, %v1311_v41  ;;  %v1325_v59 = vmul.f32 %v1324_v54, %v1311_v41 }
 0xe5c   :  { %v1278_v18 = vmul.f32 %v1277_v63, %v1271_v27 }
 0xe5d   :  { %v1290_v62 = vadd.f32 0.4994258, %v1289_v56  ;;  %v1326_v52 = vadd.f32 0.014752088, %v1325_v59  ;;  %v1315_v1 = vadd.f32 0.0036580483, %v1314_v58 }
 0xe5e   :  { %v1279_v26 = vadd.f32 0.18741608, %v1278_v18  ;;  %v1267_v56 = vmul.f32 0.5, %v2493_v31 }
 0xe5f   :  { %v1291_v0 = vmul.f32 %v1290_v62, %v1271_v27  ;;  %v1327_v2 = vmul.f32 %v1326_v52, %v1311_v41  ;;  %v1316_v6 = vmul.f32 %v1315_v1, %v1311_v41 }
 0xe60   :  { %v1280_v12 = vmul.f32 %v1279_v26, %v1271_v27 }
 0xe61   :  { %v1292_v3 = vadd.f32 1.0, %v1291_v0  ;;  %v1328_v5 = vadd.f32 0.112945676, %v1327_v2  ;;  %v1317_v10 = vadd.f32 0.05243302, %v1316_v6 }
 0xe62   :  { %v1281_v22 = vadd.f32 1.1283791, %v1280_v12  ;;  %v1489_v12 = vld [vmem:[%s2616_s22 + $0x18] sm:$0xff] }
 0xe63   :  { %1823 = vrcp.f32 %v1292_v3  ;;  %v1329_v7 = vmul.f32 %v1328_v5, %v1311_v41  ;;  %v1318_v16 = vmul.f32 %v1317_v10, %v1311_v41  ;;  %v1304_v19 = vand.u32 2147483648, %v1292_v3  ;;  %1509 = vmatpush.msrb.mxu3 %v1489_v12 }
 0xe64   :  { %v1302_v28 = vand.u32 2147483647, %v1292_v3  ;;  %vm1298_vm14 = vweird.f32 %v1292_v3  ;;  %v1282_v33 = vmul.f32 %v1281_v22, %v2486_v61 }
 0xe65   :  { %v1330_v9 = vadd.f32 0.4994258, %v1329_v7  ;;  %v1319_v29 = vadd.f32 0.18741608, %v1318_v16  ;;  %v1305_v30 = vor.u32 1.1754944e-38, %v1304_v19  ;;  %v1487_v16 = vld [vmem:[%s2616_s22 + $0x8] sm:$0xff] }
 0xe66   :  { %vm1303_vm0 = vcmp.eq.f32.partialorder %v1302_v28, 8.507059e+37 }
 0xe67   :  { %v1331_v50 = vmul.f32 %v1330_v9, %v1311_v41  ;;  %v1320_v38 = vmul.f32 %v1319_v29, %v1311_v41 }
 0xe69   :  { %v1824_v11 = vpop.eup %1823  ;;  %v1332_v15 = vadd.f32 1.0, %v1331_v50  ;;  %v1321_v40 = vadd.f32 1.1283791, %v1320_v38 }
 0xe6a   :  { %v1294_v14 = vmul.f32 %v1824_v11, %v1292_v3  ;;  %vm1299_vm13 = vweird.f32 %v1824_v11 }
 0xe6b   :  { %1825 = vrcp.f32 %v1332_v15  ;;  %vm1300_vm15 = vmor %vm1298_vm14, %vm1299_vm13  ;;  %v1344_v44 = vand.u32 2147483648, %v1332_v15  ;;  %v1342_v42 = vand.u32 2147483647, %v1332_v15  ;;  %vm1338_vm3 = vweird.f32 %v1332_v15 }
 0xe6c   :  { %v1295_v17 = vsub.f32 1.0, %v1294_v14  ;;  %v1322_v53 = vmul.f32 %v1321_v40, %v2499_v35  ;;  %v1488_v14 = vld [vmem:[%s2616_s22 + $0x10] sm:$0xff]  ;;  %vm1576_vm14 = vcmask 1024  }
 0xe6d   :  { %v1345_v61 = vor.u32 1.1754944e-38, %v1344_v44  ;;  %vm1343_vm6 = vcmp.eq.f32.partialorder %v1342_v42, 8.507059e+37  ;;  %1510 = vmatpush.msrb.mxu3 %v1488_v14 }
 0xe6e   :  { %v1296_v25 = vmul.f32 %v1824_v11, %v1295_v17 }
 0xe6f   :  { %1511 = vmatpush.msrb.mxu3 %v1487_v16 }
 0xe70   :  { %v1297_v57 = vadd.f32 %v1824_v11, %v1296_v25 }
 0xe71   :  { %v1826_v32 = vpop.eup %1825 }
 0xe72   :  { %v1301_v34 = vsel %vm1300_vm15, %v1824_v11, %v1297_v57  ;;  %v1334_v36 = vmul.f32 %v1826_v32, %v1332_v15  ;;  %vm1339_vm2 = vweird.f32 %v1826_v32  ;;  %vm1589_vm15 = vcmask 0  }
 0xe73   :  { %v1306_v27 = vsel %vm1303_vm0, %v1305_v30, %v1301_v34  ;;  %vm1340_vm4 = vmor %vm1338_vm3, %vm1339_vm2  ;;  %v1765_v34 = vld [vmem:[%s2614_s20 + $0x1] ss:$0 sm:$0xff] }
 0xe74   :  { %v1307_v37 = vmul.f32 %v1306_v27, %v1282_v33  ;;  %v1335_v39 = vsub.f32 1.0, %v1334_v36  ;;  %v1766_v36 = vld [vmem:[%s2615_s21 + $0x1] ss:$0 sm:$0xff] }
 0xe76   :  { %v1693_v43 = vclamps-f32 %v1307_v37, 1.0  ;;  %v1336_v8 = vmul.f32 %v1826_v32, %v1335_v39  ;;  %v1458_v39 = vshrl.u32 %v115_v20, 7  ;;  %v1486_v20 = vld [vmem:[%s2616_s22] sm:$0xff] }
 0xe77   :  { %1512 = vmatpush.msrb.mxu3 %v1486_v20 }
 0xe78   :  { %v1350_v47 = vadd.f32 1.0, %v1693_v43  ;;  %v1337_v51 = vadd.f32 %v1826_v32, %v1336_v8  ;;  %v1459_v42 = vmul.u32 8, %v1458_v39 }
 0xe7a   :  { %v1352_v4 = vmul.f32 %v1350_v47, %v1266_v46  ;;  %v1341_v41 = vsel %vm1340_vm4, %v1826_v32, %v1337_v51  ;;  %vm1460_vm13 = vcmp.eq.s32.totalorder %v2159_v21, %v1459_v42 }
 0xe7b   :  { %v1346_v49 = vsel %vm1343_vm6, %v1345_v61, %v1341_v41  ;;  %v1708_v61 = vsel %vm1460_vm13, 1.0, %v1944_v23  ;;  %v1521_v41 = vld [vmem:[%s2618_s24 + $0x18] sm:$0xff] }
 0xe7c   :  { %1704 = vmatmul.msk.f32.vlgmr.msrb.gmra.mxu0 %vm780_vm11, %v1352_v4  ;;  %v1347_v54 = vmul.f32 %v1346_v49, %v1322_v53  ;;  %v1520_v49 = vld [vmem:[%s2618_s24 + $0x10] sm:$0xff]  ;;  %1541 = vmatpush.msra.mxu1 %v1521_v41 }
 0xe7e   :  { %v1694_v55 = vclamps-f32 %v1347_v54, 1.0  ;;  %v1519_v54 = vld [vmem:[%s2618_s24 + $0x8] sm:$0xff]  ;;  %1542 = vmatpush.msra.mxu1 %v1520_v49 }
 0xe80   :  { %v1351_v58 = vadd.f32 1.0, %v1694_v55  ;;  %v1518_v55 = vld [vmem:[%s2618_s24] sm:$0xff]  ;;  %1543 = vmatpush.msra.mxu1 %v1519_v54 }
 0xe82   :  { %v1353_v59 = vmul.f32 %v1351_v58, %v1267_v56  ;;  %1544 = vmatpush.msra.mxu1 %v1518_v55  ;;  %v1767_v56 = vld [vmem:[%s2617_s23] ss:$0 sm:$0xff] }
 0xe84   :  { %1705 = vmatmul.msk.f32.gmra.mxu0 %vm780_vm11, %v1353_v59 }
 0xef9   :  { %v1391_v24 = vpop.f32.mrf.mxu0 }
 0xefa   :  { %v1392_v52 = vadd.f32 %v1764_v60, %v1391_v24 }
 0xefc   :  { %v1397_v1 = vadd.f32 %v1392_v52, %v2472_v13  ;;  %v1564_v52 = vld [vmem:[%s2652_s5] sm:$0x3] }
 0xefe   :  { %v1403_v31 = vsel %vm218_vm5, %v1397_v1, 0.0 }
 0xf01   :  { %v1394_v62 = vpop.f32.mrf.mxu0 }
 0xf02   :  { %v1395_v35 = vadd.f32 %v1764_v60, %v1394_v62  ;;  %v1768_v60 = vld [vmem:[#allocation5] ss:$0 sm:$0xff] }
 0xf04   :  { %v1398_v63 = vadd.f32 %v1395_v35, %v2476_v48 }
 0xf06   :  { %v1406_v0 = vsel %vm218_vm5, %v1398_v63, 0.0 }
 0xf07   :  { %1407 = vadd.xlane.f32.xlu0 %v1406_v0 }
 0xf0f   :  { %1404 = vadd.xlane.f32.xlu0 %v1403_v31 }
 0xf7a   :  { %v1408_v2 = vpop.xlane.xlu0 %1407 }
 0xf7b   :  { %v1410_v3 = vmul.f32 %v1408_v2, %v2170_v45 }
 0xf7d   :  { %v1412_v18 = vsub.f32 %v1398_v63, %v1410_v3 }
 0xf7f   :  { %v1414_v5 = vmul.f32 %v1412_v18, %v1412_v18 }
 0xf81   :  { %v1418_v6 = vsel %vm218_vm5, %v1414_v5, 0.0 }
 0xf82   :  { %1419 = vadd.xlane.f32.xlu0 %v1418_v6  ;;  %v1405_v7 = vpop.xlane.xlu0 %1404 }
 0xf83   :  { %v1409_v48 = vmul.f32 %v1405_v7, %v2170_v45 }
 0xf85   :  { %v1411_v26 = vsub.f32 %v1397_v1, %v1409_v48 }
 0xf87   :  { %v1413_v9 = vmul.f32 %v1411_v26, %v1411_v26 }
 0xf89   :  { %v1415_v10 = vsel %vm218_vm5, %v1413_v9, 0.0 }
 0xf8a   :  { %1416 = vadd.xlane.f32.xlu0 %v1415_v10 }
 0xff5   :  { %v1420_v13 = vpop.xlane.xlu0 %1419 }
 0xff6   :  { %v1422_v50 = vmul.f32 %v1420_v13, %v2170_v45 }
 0xff8   :  { %v1424_v11 = vadd.f32 1e-12, %v1422_v50 }
 0xffa   :  { %1827 = vrsqrt.f32 %v1424_v11  ;;  %vm1441_vm7 = vweird.f32 %v1424_v11 }
 0xffd   :  { %v1417_v15 = vpop.xlane.xlu0 %1416 }
 0xffe   :  { %v1421_v17 = vmul.f32 %v1417_v15, %v2170_v45 }
0x1000   :  { %v1828_v19 = vpop.eup %1827  ;;  %v1423_v22 = vadd.f32 1e-12, %v1421_v17 }
0x1001   :  { %v1436_v25 = vmul.f32 %v1828_v19, %v1424_v11  ;;  %vm1442_vm11 = vweird.f32 %v1828_v19 }
0x1002   :  { %1829 = vrsqrt.f32 %v1423_v22  ;;  %vm1443_vm8 = vmor %vm1441_vm7, %vm1442_vm11  ;;  %vm1431_vm10 = vweird.f32 %v1423_v22 }
0x1003   :  { %v1437_v28 = vmul.f32 %v1828_v19, %v1436_v25 }
0x1005   :  { %v1438_v29 = vmul.f32 0.5, %v1437_v28 }
0x1007   :  { %v1439_v57 = vsub.f32 1.5, %v1438_v29 }
0x1008   :  { %v1830_v30 = vpop.eup %1829 }
0x1009   :  { %v1440_v32 = vmul.f32 %v1828_v19, %v1439_v57  ;;  %v1426_v33 = vmul.f32 %v1830_v30, %v1423_v22  ;;  %vm1432_vm9 = vweird.f32 %v1830_v30 }
0x100a   :  { %vm1433_vm12 = vmor %vm1431_vm10, %vm1432_vm9 }
0x100b   :  { %v1444_v45 = vsel %vm1443_vm8, %v1828_v19, %v1440_v32  ;;  %v1427_v27 = vmul.f32 %v1830_v30, %v1426_v33 }
0x100c   :  { %v1446_v38 = vmul.f32 %v1444_v45, %v1412_v18 }
0x100d   :  { %v1428_v37 = vmul.f32 0.5, %v1427_v27 }
0x100e   :  { %v1451_v43 = vmul.f32 %v1765_v34, %v1446_v38 }
0x100f   :  { %v1429_v44 = vsub.f32 1.5, %v1428_v37 }
0x1010   :  { %v1456_v40 = vadd.f32 %v1766_v36, %v1451_v43 }
0x1011   :  { %v1430_v8 = vmul.f32 %v1830_v30, %v1429_v44 }
0x1012   :  { %1480 = vmatpush.msrb.mxu2 %v1456_v40 }
0x1013   :  { %v1434_v46 = vsel %vm1433_vm12, %v1830_v30, %v1430_v8 }
0x1014   :  { %v1445_v47 = vmul.f32 %v1434_v46, %v1411_v26 }
0x1016   :  { %v1450_v51 = vmul.f32 %v1765_v34, %v1445_v47 }
0x1018   :  { %v1455_v4 = vadd.f32 %v1766_v36, %v1450_v51 }
0x101a   :  { %1481 = vmatpush.msrb.mxu2 %v1455_v4 }
0x101b   :  { %1709 = vmatmul.msk.f32.vlgmr.msrb.gmra.mxu2 %vm148_vm1, %v1708_v61  ;;  %vm1549_vm1 = vcmask 9216  }
0x109e   :  { %v1483_v53 = vpop.f32.mrf.mxu2 }
0x109f   :  { %1710 = vmatmul.msk.f32.vlgmr.msrb.gmra.mxu3 %vm218_vm5, %v1483_v53 }
0x1122   :  { %v1514_v58 = vpop.f32.mrf.mxu3 }
0x1123   :  { %v1515_v59 = vadd.f32 %v1767_v56, %v1514_v58 }
0x1125   :  { %1831 = vtanh.f32 %v1515_v59 }
0x112b   :  { %v1832_v24 = vpop.eup %1831 }
0x112c   :  { %1711 = vmatmul.msk.f32.vlgmr.msra.gmra.mxu1 %vm218_vm5, %v1832_v24 }
0x11a9   :  { %v1546_v62 = vpop.f32.mrf.mxu1 }
0x11aa   :  { %v1547_v35 = vadd.f32 %v1768_v60, %v1546_v62 }
0x11ac   :  { %v1551_v63 = vsel %vm1549_vm1, %v1547_v35, -inf  ;;  %1550 = vst.msk [vmem:[#allocation7] sm:$0x3] %vm1549_vm1, %v1547_v35 }
0x11ad   :  { %1552 = vmax.xlane.f32.xlu2 %v1551_v63  ;;  %1601 = dma.vmem_to_hbm [thread:$0]  %s1597_s19, 32, %s1599_s18, [#allocation4]  }
0x11c5   :  { %1566 = vperm.xlu2 %1748, %v1564_v52  }
0x1220   :  { %v1553_v0 = vpop.xlane.xlu2 %1552 }
0x1221   :  { %v1554_v1 = vsub.f32 %v1547_v35, %v1553_v0 }
0x1223   :  { %v1555_v31 = vmul.f32 1.442695, %v1554_v1 }
0x1225   :  { %1833 = vpow2.f32 %v1555_v31 }
0x1228   :  { %v1567_v5 = vpop.permute.xlu2 %1566 }
0x1229   :  { %vm1568_vm5 = vcmp.eq.s32.totalorder %v2159_v21, %v1567_v5 }
0x122a   :  { %v1712_v26 = vsel %vm1568_vm5, 1.0, %v1944_v23 }
0x122b   :  { %v1834_v2 = vpop.eup %1833 }
0x122c   :  { %v1557_v3 = vsel %vm1549_vm1, %v1834_v2, 0.0 }
0x122d   :  { %1558 = vadd.xlane.f32.xlu0 %v1557_v3 }
0x12a0   :  { %v1559_v18 = vpop.xlane.xlu0 %1558 }
0x12a1   :  { %1835 = vlog2.f32 %v1559_v18 }
0x12a7   :  { %v1836_v6 = vpop.eup %1835 }
0x12a8   :  { %v1561_v7 = vmul.f32 0.6931472, %v1836_v6 }
0x12aa   :  { %v1562_v48 = vadd.f32 %v1561_v7, %v1553_v0 }
0x12ac   :  { %v1563_v9 = vsub.f32 %v1547_v35, %v1562_v48 }
0x12ae   :  { %v1571_v10 = vmul.f32 %v1712_v26, %v1563_v9 }
0x12b0   :  { %v1572_v13 = vsel %vm1549_vm1, %v1571_v10, 0.0 }
0x12b1   :  { %1573 = vadd.xlane.f32.xlu1 %v1572_v13 }
0x1324   :  { %v1574_v50 = vpop.xlane.xlu1 %1573 }
0x1325   :  { %v1575_v11 = vsub.f32 0.0, %v1574_v50 }
0x1327   :  { %v1577_v12 = vsel %vm1576_vm14, %v1575_v11, 0.0 }
0x1328   :  { %1578 = vadd.xlane.f32.xlu0 %v1577_v12 }
0x139b   :  { %v1579_v21 = vpop.xlane.xlu0 %1578 }
0x139c   :  { %v1580_v23 = vrot.slane %v1579_v21, 4 }
0x139e   :  { %v1581_v14 = vadd.f32 %v1580_v23, %v1579_v21 }
0x13a0   :  { %v1582_v15 = vrot.slane %v1581_v14, 2 }
0x13a2   :  { %v1583_v16 = vadd.f32 %v1582_v15, %v1581_v14 }
0x13a4   :  { %v1584_v17 = vrot.slane %v1583_v16, 1 }
0x13a6   :  { %v1585_v19 = vadd.f32 %v1584_v17, %v1583_v16 }
0x13a8   :  { %1713 = vpush %v1585_v19 }
0x13d9   :  { %s1714_s26 = spop %1713 }
0x13da   :  { %v1587_v22 = vstv %s1714_s26 }
0x13db   :  { %v1588_v25 = vmul.f32 0.5, %v1587_v22 }
0x13dd   :  { %1590 = vst.msk [vmem:[#allocation8] sm:$0x1] %vm1589_vm15, %v1588_v25 }
0x13de   :  { %1612 = dma.vmem_to_hbm [thread:$0]  %s1608_s10, 16, %s1610_s15, [#allocation9]  }
0x13df   :  { %1937 = dma.done.wait [#allocation4], 32  }
0x13e0   :  { %1938 = vsyncadd [#allocation4], 4294967264 }
0x13e1   :  { %1939 = dma.done.wait [#allocation9], 16  }
0x13e2   :  { %1940 = vsyncadd [#allocation9], 4294967280 }
0x13e3   :  { %1621 = vsyncpa [#allocation3], 1 }
0x13e4   :  { %1622 = vsyncpa [#allocation6], 1 }
0x13e5   :  { %1623 = vsyncpa [#allocation4], 1 }
0x13e6   :  { %1624 = vsyncpa [#allocation9], 1 }

</bundles_post_ra>
